<compile_context>
chip_gen: v6e
topology: v6e:2x2x1
jax: 0.10.0
libtpu: 0.0.40
codegen_flags: <defaults>
</compile_context>

<pallas_src>
import jax
import jax.numpy as jnp
from jax.experimental import pallas as pl
from jax.experimental.pallas import tpu as pltpu

# Model / problem sizes (small, consistent with the module's forward)
VOCAB = 50
EMBED = 16
HIDDEN = 32
LAYERS = 2          # layer_dim
OUT = 4             # output_dim
BATCH = 2
SEQ = 8


def lstm_model_kernel(ids_ref, emb_tbl_ref,
                      w_ih0_ref, w_hh0_ref, b0_ref,
                      w_ih1_ref, w_hh1_ref, b1_ref,
                      fc_w_ref, fc_b_ref,
                      out_ref):
    """Whole hot path in one kernel: embedding gather, 2-layer LSTM, FC, softmax.

    ids_ref      : (S*B, 1) int32, time-major (row t*B + b)
    emb_tbl_ref  : (VOCAB, E)   f32
    w_ih*_ref    : (in, 4H)     f32  (pre-transposed, lane-dense)
    w_hh*_ref    : (H, 4H)      f32  (pre-transposed, lane-dense)
    b*_ref       : (1, 4H)      f32  (b_ih + b_hh summed)
    fc_w_ref     : (H, OUT)     f32  (pre-transposed)
    fc_b_ref     : (1, OUT)     f32
    out_ref      : (B, OUT)     f32  softmax probabilities
    """
    SB = ids_ref.shape[0]          # S * B
    B = out_ref.shape[0]
    S = SB // B
    H = w_hh0_ref.shape[0]
    V = emb_tbl_ref.shape[0]
    f32 = jnp.float32

    # ---- Fused embedding gather: one-hot (S*B, V) @ table (V, E) on the MXU.
    ids = ids_ref[...]                                               # (S*B, 1)
    onehot = (jax.lax.broadcasted_iota(jnp.int32, (SB, V), 1) == ids).astype(f32)
    emb_flat = jnp.dot(onehot, emb_tbl_ref[...],
                       preferred_element_type=f32)                   # (S*B, E)

    # ---- Layer-0 input projection hoisted over the whole sequence.
    gates_in0 = (jnp.dot(emb_flat, w_ih0_ref[...], preferred_element_type=f32)
                 + b0_ref[...])                                      # (S*B, 4H)

    w_hh0 = w_hh0_ref[...]
    w_hh1 = w_hh1_ref[...]

    def step(gates_pre, h, c, w_hh):
        # PyTorch LSTM cell, gate order (i, f, g, o); only h @ W_hh is serial.
        g = gates_pre + jnp.dot(h, w_hh, preferred_element_type=f32)  # (B, 4H)
        sg = jax.nn.sigmoid(g)      # one full-vreg EUP pass
        th = jnp.tanh(g)            # one full-vreg EUP pass
        i = sg[:, 0 * H:1 * H]
        f = sg[:, 1 * H:2 * H]
        gg = th[:, 2 * H:3 * H]
        o = sg[:, 3 * H:4 * H]
        c_new = f * c + i * gg
        h_new = o * jnp.tanh(c_new)
        return h_new, c_new

    # ---- Layer 0 recurrence (zero-initialized states, as in the PyTorch forward).
    h = jnp.zeros((B, H), f32)
    c = jnp.zeros((B, H), f32)
    h0_rows = []
    for t in range(S):              # S = 8, small & static: Python-unrolled
        h, c = step(gates_in0[t * B:(t + 1) * B, :], h, c, w_hh0)
        h0_rows.append(h)
    h0_seq = jnp.concatenate(h0_rows, axis=0)                        # (S*B, H)

    # ---- Layer-1 input projection hoisted (layer-0 sequence now known).
    gates_in1 = (jnp.dot(h0_seq, w_ih1_ref[...], preferred_element_type=f32)
                 + b1_ref[...])                                      # (S*B, 4H)

    h = jnp.zeros((B, H), f32)
    c = jnp.zeros((B, H), f32)
    for t in range(S):
        h, c = step(gates_in1[t * B:(t + 1) * B, :], h, c, w_hh1)

    # ---- out = fc(out[:, -1, :]) ; softmax over dim=1
    logits = (jnp.dot(h, fc_w_ref[...], preferred_element_type=f32)
              + fc_b_ref[...])                                       # (B, OUT)
    m = jnp.max(logits, axis=1, keepdims=True)
    e = jnp.exp(logits - m)
    out_ref[...] = e / jnp.sum(e, axis=1, keepdims=True)


def init_params(key):
    """Deterministic parameter init mimicking the module's shapes."""
    ks = jax.random.split(key, 12)
    scale = 0.1
    p = {}
    p["embedding"] = scale * jax.random.normal(ks[0], (VOCAB, EMBED), jnp.float32)
    # layer 0: input size = EMBED ; layer 1: input size = HIDDEN
    p["w_ih0"] = scale * jax.random.normal(ks[1], (4 * HIDDEN, EMBED), jnp.float32)
    p["w_hh0"] = scale * jax.random.normal(ks[2], (4 * HIDDEN, HIDDEN), jnp.float32)
    p["b_ih0"] = scale * jax.random.normal(ks[3], (4 * HIDDEN,), jnp.float32)
    p["b_hh0"] = scale * jax.random.normal(ks[4], (4 * HIDDEN,), jnp.float32)
    p["w_ih1"] = scale * jax.random.normal(ks[5], (4 * HIDDEN, HIDDEN), jnp.float32)
    p["w_hh1"] = scale * jax.random.normal(ks[6], (4 * HIDDEN, HIDDEN), jnp.float32)
    p["b_ih1"] = scale * jax.random.normal(ks[7], (4 * HIDDEN,), jnp.float32)
    p["b_hh1"] = scale * jax.random.normal(ks[8], (4 * HIDDEN,), jnp.float32)
    p["fc_w"] = scale * jax.random.normal(ks[9], (OUT, HIDDEN), jnp.float32)
    p["fc_b"] = scale * jax.random.normal(ks[10], (OUT,), jnp.float32)
    return p


def lstm_model_forward(x_ids, params):
    B, S = x_ids.shape

    # Layout plumbing only (no compute on the host side):
    #   time-major flat token ids (row t*B + b), pre-transposed lane-dense
    #   weights (last dim 4H = 128), and summed per-layer biases.
    ids_tm = x_ids.T.reshape(S * B, 1).astype(jnp.int32)
    w_ih0_t = params["w_ih0"].T                      # (E, 4H)
    w_hh0_t = params["w_hh0"].T                      # (H, 4H)
    w_ih1_t = params["w_ih1"].T                      # (H, 4H)
    w_hh1_t = params["w_hh1"].T                      # (H, 4H)
    fc_w_t = params["fc_w"].T                        # (H, OUT)
    b0 = (params["b_ih0"] + params["b_hh0"]).reshape(1, 4 * HIDDEN)
    b1 = (params["b_ih1"] + params["b_hh1"]).reshape(1, 4 * HIDDEN)
    fc_b = params["fc_b"].reshape(1, OUT)

    vmem = lambda: pl.BlockSpec(memory_space=pltpu.MemorySpace.VMEM)

    out = pl.pallas_call(
        lstm_model_kernel,
        out_shape=jax.ShapeDtypeStruct((B, OUT), jnp.float32),
        in_specs=[vmem() for _ in range(10)],
        out_specs=vmem(),
    )(ids_tm, params["embedding"],
      w_ih0_t, w_hh0_t, b0,
      w_ih1_t, w_hh1_t, b1,
      fc_w_t, fc_b)
    return out


def lstm_model_reference(x_ids, params):
    """Pure-JAX reference matching the PyTorch forward (for a sanity check)."""
    emb = jnp.take(params["embedding"], x_ids, axis=0)    # (B, S, E)
    B, S, _ = emb.shape
    H = HIDDEN

    def cell(x_t, h, c, w_ih, w_hh, b_ih, b_hh):
        g = x_t @ w_ih.T + h @ w_hh.T + b_ih + b_hh
        i = jax.nn.sigmoid(g[:, 0 * H:1 * H])
        f = jax.nn.sigmoid(g[:, 1 * H:2 * H])
        gg = jnp.tanh(g[:, 2 * H:3 * H])
        o = jax.nn.sigmoid(g[:, 3 * H:4 * H])
        c = f * c + i * gg
        h = o * jnp.tanh(c)
        return h, c

    h0 = jnp.zeros((B, H)); c0 = jnp.zeros((B, H))
    h1 = jnp.zeros((B, H)); c1 = jnp.zeros((B, H))
    for t in range(S):
        h0, c0 = cell(emb[:, t, :], h0, c0,
                      params["w_ih0"], params["w_hh0"],
                      params["b_ih0"], params["b_hh0"])
        h1, c1 = cell(h0, h1, c1,
                      params["w_ih1"], params["w_hh1"],
                      params["b_ih1"], params["b_hh1"])
    logits = h1 @ params["fc_w"].T + params["fc_b"]
    return jax.nn.softmax(logits, axis=1)


if __name__ == "__main__":
    key = jax.random.PRNGKey(0)
    k_param, k_data = jax.random.split(key)

    params = init_params(k_param)
    x_ids = jax.random.randint(k_data, (BATCH, SEQ), 0, VOCAB, dtype=jnp.int32)

    probs = lstm_model_forward(x_ids, params)
    probs = jax.block_until_ready(probs)

    assert probs.shape == (BATCH, OUT)
    assert bool(jnp.all(jnp.isfinite(probs)))
    # softmax rows sum to 1
    assert bool(jnp.allclose(jnp.sum(probs, axis=1), 1.0, atol=1e-5))
    # matches the pure-JAX reference of the PyTorch forward
    ref = lstm_model_reference(x_ids, params)
    assert bool(jnp.allclose(probs, ref, atol=1e-3, rtol=1e-3))

    print("KERNEL_OK")
</pallas_src>

<mosaic_0001>
module attributes {stable_mosaic.version = 11 : i64} {
  func.func @lstm_model_kernel(%arg0: memref<16x1xi32, #tpu.memory_space<vmem>>, %arg1: memref<50x16xf32, #tpu.memory_space<vmem>>, %arg2: memref<16x128xf32, #tpu.memory_space<vmem>>, %arg3: memref<32x128xf32, #tpu.memory_space<vmem>>, %arg4: memref<1x128xf32, #tpu.memory_space<vmem>>, %arg5: memref<32x128xf32, #tpu.memory_space<vmem>>, %arg6: memref<32x128xf32, #tpu.memory_space<vmem>>, %arg7: memref<1x128xf32, #tpu.memory_space<vmem>>, %arg8: memref<32x4xf32, #tpu.memory_space<vmem>>, %arg9: memref<1x4xf32, #tpu.memory_space<vmem>>, %arg10: memref<2x4xf32, #tpu.memory_space<vmem>>) attributes {dimension_semantics = [], scalar_prefetch = 0 : i64, scratch_operands = 0 : i64, tpu.core_type = #tpu.core_type<tc>} {
    %c0 = arith.constant 0 : index
    %c0_0 = arith.constant 0 : index
    %0 = vector.load %arg0[%c0, %c0_0] : memref<16x1xi32, #tpu.memory_space<vmem>>, vector<16x1xi32>
    %1 = tpu.iota {dimensions = array<i32: 1>} : vector<16x50xi32>
    %2 = vector.broadcast %0 : vector<16x1xi32> to vector<16x50xi32>
    %3 = arith.cmpi eq, %1, %2 : vector<16x50xi32>
    %4 = arith.extui %3 : vector<16x50xi1> to vector<16x50xi32>
    %5 = arith.sitofp %4 : vector<16x50xi32> to vector<16x50xf32>
    %c0_1 = arith.constant 0 : index
    %c0_2 = arith.constant 0 : index
    %6 = vector.load %arg1[%c0_1, %c0_2] : memref<50x16xf32, #tpu.memory_space<vmem>>, vector<50x16xf32>
    %cst = arith.constant dense<0.000000e+00> : vector<16x16xf32>
    %7 = tpu.matmul %5, %6, %cst {dimension_numbers = #tpu.dot_dimension_numbers<[1], [0], [0], [1], [0, 0, 1, 1], [], []>} : vector<16x50xf32>, vector<50x16xf32>, vector<16x16xf32> -> vector<16x16xf32>
    %c0_3 = arith.constant 0 : index
    %c0_4 = arith.constant 0 : index
    %8 = vector.load %arg2[%c0_3, %c0_4] : memref<16x128xf32, #tpu.memory_space<vmem>>, vector<16x128xf32>
    %cst_5 = arith.constant dense<0.000000e+00> : vector<16x128xf32>
    %9 = tpu.matmul %7, %8, %cst_5 {dimension_numbers = #tpu.dot_dimension_numbers<[1], [0], [0], [1], [0, 0, 1, 1], [], []>} : vector<16x16xf32>, vector<16x128xf32>, vector<16x128xf32> -> vector<16x128xf32>
    %c0_6 = arith.constant 0 : index
    %c0_7 = arith.constant 0 : index
    %10 = vector.load %arg4[%c0_6, %c0_7] : memref<1x128xf32, #tpu.memory_space<vmem>>, vector<1x128xf32>
    %11 = vector.broadcast %10 : vector<1x128xf32> to vector<16x128xf32>
    %12 = arith.addf %9, %11 : vector<16x128xf32>
    %c0_8 = arith.constant 0 : index
    %c0_9 = arith.constant 0 : index
    %13 = vector.load %arg3[%c0_8, %c0_9] : memref<32x128xf32, #tpu.memory_space<vmem>>, vector<32x128xf32>
    %c0_10 = arith.constant 0 : index
    %c0_11 = arith.constant 0 : index
    %14 = vector.load %arg6[%c0_10, %c0_11] : memref<32x128xf32, #tpu.memory_space<vmem>>, vector<32x128xf32>
    %cst_12 = arith.constant 0.000000e+00 : f32
    %15 = vector.broadcast %cst_12 : f32 to vector<2x32xf32>
    %cst_13 = arith.constant 0.000000e+00 : f32
    %16 = vector.broadcast %cst_13 : f32 to vector<2x32xf32>
    %17 = vector.extract_strided_slice %12 {offsets = [0, 0], sizes = [2, 128], strides = [1, 1]} : vector<16x128xf32> to vector<2x128xf32>
    %cst_14 = arith.constant dense<0.000000e+00> : vector<2x128xf32>
    %18 = tpu.matmul %15, %13, %cst_14 {dimension_numbers = #tpu.dot_dimension_numbers<[1], [0], [0], [1], [0, 0, 1, 1], [], []>} : vector<2x32xf32>, vector<32x128xf32>, vector<2x128xf32> -> vector<2x128xf32>
    %19 = arith.addf %17, %18 : vector<2x128xf32>
    %20 = arith.negf %19 : vector<2x128xf32>
    %21 = math.exp %20 : vector<2x128xf32>
    %cst_15 = arith.constant 1.000000e+00 : f32
    %22 = vector.broadcast %cst_15 : f32 to vector<2x128xf32>
    %23 = arith.addf %22, %21 : vector<2x128xf32>
    %24 = arith.divf %22, %23 : vector<2x128xf32>
    %25 = math.tanh %19 : vector<2x128xf32>
    %26 = vector.extract_strided_slice %24 {offsets = [0, 0], sizes = [2, 32], strides = [1, 1]} : vector<2x128xf32> to vector<2x32xf32>
    %27 = vector.extract_strided_slice %24 {offsets = [0, 32], sizes = [2, 32], strides = [1, 1]} : vector<2x128xf32> to vector<2x32xf32>
    %28 = vector.extract_strided_slice %25 {offsets = [0, 64], sizes = [2, 32], strides = [1, 1]} : vector<2x128xf32> to vector<2x32xf32>
    %29 = vector.extract_strided_slice %24 {offsets = [0, 96], sizes = [2, 32], strides = [1, 1]} : vector<2x128xf32> to vector<2x32xf32>
    %30 = arith.mulf %27, %16 : vector<2x32xf32>
    %31 = arith.mulf %26, %28 : vector<2x32xf32>
    %32 = arith.addf %30, %31 : vector<2x32xf32>
    %33 = math.tanh %32 : vector<2x32xf32>
    %34 = arith.mulf %29, %33 : vector<2x32xf32>
    %35 = vector.extract_strided_slice %12 {offsets = [2, 0], sizes = [2, 128], strides = [1, 1]} : vector<16x128xf32> to vector<2x128xf32>
    %cst_16 = arith.constant dense<0.000000e+00> : vector<2x128xf32>
    %36 = tpu.matmul %34, %13, %cst_16 {dimension_numbers = #tpu.dot_dimension_numbers<[1], [0], [0], [1], [0, 0, 1, 1], [], []>} : vector<2x32xf32>, vector<32x128xf32>, vector<2x128xf32> -> vector<2x128xf32>
    %37 = arith.addf %35, %36 : vector<2x128xf32>
    %38 = arith.negf %37 : vector<2x128xf32>
    %39 = math.exp %38 : vector<2x128xf32>
    %cst_17 = arith.constant 1.000000e+00 : f32
    %40 = vector.broadcast %cst_17 : f32 to vector<2x128xf32>
    %41 = arith.addf %40, %39 : vector<2x128xf32>
    %42 = arith.divf %40, %41 : vector<2x128xf32>
    %43 = math.tanh %37 : vector<2x128xf32>
    %44 = vector.extract_strided_slice %42 {offsets = [0, 0], sizes = [2, 32], strides = [1, 1]} : vector<2x128xf32> to vector<2x32xf32>
    %45 = vector.extract_strided_slice %42 {offsets = [0, 32], sizes = [2, 32], strides = [1, 1]} : vector<2x128xf32> to vector<2x32xf32>
    %46 = vector.extract_strided_slice %43 {offsets = [0, 64], sizes = [2, 32], strides = [1, 1]} : vector<2x128xf32> to vector<2x32xf32>
    %47 = vector.extract_strided_slice %42 {offsets = [0, 96], sizes = [2, 32], strides = [1, 1]} : vector<2x128xf32> to vector<2x32xf32>
    %48 = arith.mulf %45, %32 : vector<2x32xf32>
    %49 = arith.mulf %44, %46 : vector<2x32xf32>
    %50 = arith.addf %48, %49 : vector<2x32xf32>
    %51 = math.tanh %50 : vector<2x32xf32>
    %52 = arith.mulf %47, %51 : vector<2x32xf32>
    %53 = vector.extract_strided_slice %12 {offsets = [4, 0], sizes = [2, 128], strides = [1, 1]} : vector<16x128xf32> to vector<2x128xf32>
    %cst_18 = arith.constant dense<0.000000e+00> : vector<2x128xf32>
    %54 = tpu.matmul %52, %13, %cst_18 {dimension_numbers = #tpu.dot_dimension_numbers<[1], [0], [0], [1], [0, 0, 1, 1], [], []>} : vector<2x32xf32>, vector<32x128xf32>, vector<2x128xf32> -> vector<2x128xf32>
    %55 = arith.addf %53, %54 : vector<2x128xf32>
    %56 = arith.negf %55 : vector<2x128xf32>
    %57 = math.exp %56 : vector<2x128xf32>
    %cst_19 = arith.constant 1.000000e+00 : f32
    %58 = vector.broadcast %cst_19 : f32 to vector<2x128xf32>
    %59 = arith.addf %58, %57 : vector<2x128xf32>
    %60 = arith.divf %58, %59 : vector<2x128xf32>
    %61 = math.tanh %55 : vector<2x128xf32>
    %62 = vector.extract_strided_slice %60 {offsets = [0, 0], sizes = [2, 32], strides = [1, 1]} : vector<2x128xf32> to vector<2x32xf32>
    %63 = vector.extract_strided_slice %60 {offsets = [0, 32], sizes = [2, 32], strides = [1, 1]} : vector<2x128xf32> to vector<2x32xf32>
    %64 = vector.extract_strided_slice %61 {offsets = [0, 64], sizes = [2, 32], strides = [1, 1]} : vector<2x128xf32> to vector<2x32xf32>
    %65 = vector.extract_strided_slice %60 {offsets = [0, 96], sizes = [2, 32], strides = [1, 1]} : vector<2x128xf32> to vector<2x32xf32>
    %66 = arith.mulf %63, %50 : vector<2x32xf32>
    %67 = arith.mulf %62, %64 : vector<2x32xf32>
    %68 = arith.addf %66, %67 : vector<2x32xf32>
    %69 = math.tanh %68 : vector<2x32xf32>
    %70 = arith.mulf %65, %69 : vector<2x32xf32>
    %71 = vector.extract_strided_slice %12 {offsets = [6, 0], sizes = [2, 128], strides = [1, 1]} : vector<16x128xf32> to vector<2x128xf32>
    %cst_20 = arith.constant dense<0.000000e+00> : vector<2x128xf32>
    %72 = tpu.matmul %70, %13, %cst_20 {dimension_numbers = #tpu.dot_dimension_numbers<[1], [0], [0], [1], [0, 0, 1, 1], [], []>} : vector<2x32xf32>, vector<32x128xf32>, vector<2x128xf32> -> vector<2x128xf32>
    %73 = arith.addf %71, %72 : vector<2x128xf32>
    %74 = arith.negf %73 : vector<2x128xf32>
    %75 = math.exp %74 : vector<2x128xf32>
    %cst_21 = arith.constant 1.000000e+00 : f32
    %76 = vector.broadcast %cst_21 : f32 to vector<2x128xf32>
    %77 = arith.addf %76, %75 : vector<2x128xf32>
    %78 = arith.divf %76, %77 : vector<2x128xf32>
    %79 = math.tanh %73 : vector<2x128xf32>
    %80 = vector.extract_strided_slice %78 {offsets = [0, 0], sizes = [2, 32], strides = [1, 1]} : vector<2x128xf32> to vector<2x32xf32>
    %81 = vector.extract_strided_slice %78 {offsets = [0, 32], sizes = [2, 32], strides = [1, 1]} : vector<2x128xf32> to vector<2x32xf32>
    %82 = vector.extract_strided_slice %79 {offsets = [0, 64], sizes = [2, 32], strides = [1, 1]} : vector<2x128xf32> to vector<2x32xf32>
    %83 = vector.extract_strided_slice %78 {offsets = [0, 96], sizes = [2, 32], strides = [1, 1]} : vector<2x128xf32> to vector<2x32xf32>
    %84 = arith.mulf %81, %68 : vector<2x32xf32>
    %85 = arith.mulf %80, %82 : vector<2x32xf32>
    %86 = arith.addf %84, %85 : vector<2x32xf32>
    %87 = math.tanh %86 : vector<2x32xf32>
    %88 = arith.mulf %83, %87 : vector<2x32xf32>
    %89 = vector.extract_strided_slice %12 {offsets = [8, 0], sizes = [2, 128], strides = [1, 1]} : vector<16x128xf32> to vector<2x128xf32>
    %cst_22 = arith.constant dense<0.000000e+00> : vector<2x128xf32>
    %90 = tpu.matmul %88, %13, %cst_22 {dimension_numbers = #tpu.dot_dimension_numbers<[1], [0], [0], [1], [0, 0, 1, 1], [], []>} : vector<2x32xf32>, vector<32x128xf32>, vector<2x128xf32> -> vector<2x128xf32>
    %91 = arith.addf %89, %90 : vector<2x128xf32>
    %92 = arith.negf %91 : vector<2x128xf32>
    %93 = math.exp %92 : vector<2x128xf32>
    %cst_23 = arith.constant 1.000000e+00 : f32
    %94 = vector.broadcast %cst_23 : f32 to vector<2x128xf32>
    %95 = arith.addf %94, %93 : vector<2x128xf32>
    %96 = arith.divf %94, %95 : vector<2x128xf32>
    %97 = math.tanh %91 : vector<2x128xf32>
    %98 = vector.extract_strided_slice %96 {offsets = [0, 0], sizes = [2, 32], strides = [1, 1]} : vector<2x128xf32> to vector<2x32xf32>
    %99 = vector.extract_strided_slice %96 {offsets = [0, 32], sizes = [2, 32], strides = [1, 1]} : vector<2x128xf32> to vector<2x32xf32>
    %100 = vector.extract_strided_slice %97 {offsets = [0, 64], sizes = [2, 32], strides = [1, 1]} : vector<2x128xf32> to vector<2x32xf32>
    %101 = vector.extract_strided_slice %96 {offsets = [0, 96], sizes = [2, 32], strides = [1, 1]} : vector<2x128xf32> to vector<2x32xf32>
    %102 = arith.mulf %99, %86 : vector<2x32xf32>
    %103 = arith.mulf %98, %100 : vector<2x32xf32>
    %104 = arith.addf %102, %103 : vector<2x32xf32>
    %105 = math.tanh %104 : vector<2x32xf32>
    %106 = arith.mulf %101, %105 : vector<2x32xf32>
    %107 = vector.extract_strided_slice %12 {offsets = [10, 0], sizes = [2, 128], strides = [1, 1]} : vector<16x128xf32> to vector<2x128xf32>
    %cst_24 = arith.constant dense<0.000000e+00> : vector<2x128xf32>
    %108 = tpu.matmul %106, %13, %cst_24 {dimension_numbers = #tpu.dot_dimension_numbers<[1], [0], [0], [1], [0, 0, 1, 1], [], []>} : vector<2x32xf32>, vector<32x128xf32>, vector<2x128xf32> -> vector<2x128xf32>
    %109 = arith.addf %107, %108 : vector<2x128xf32>
    %110 = arith.negf %109 : vector<2x128xf32>
    %111 = math.exp %110 : vector<2x128xf32>
    %cst_25 = arith.constant 1.000000e+00 : f32
    %112 = vector.broadcast %cst_25 : f32 to vector<2x128xf32>
    %113 = arith.addf %112, %111 : vector<2x128xf32>
    %114 = arith.divf %112, %113 : vector<2x128xf32>
    %115 = math.tanh %109 : vector<2x128xf32>
    %116 = vector.extract_strided_slice %114 {offsets = [0, 0], sizes = [2, 32], strides = [1, 1]} : vector<2x128xf32> to vector<2x32xf32>
    %117 = vector.extract_strided_slice %114 {offsets = [0, 32], sizes = [2, 32], strides = [1, 1]} : vector<2x128xf32> to vector<2x32xf32>
    %118 = vector.extract_strided_slice %115 {offsets = [0, 64], sizes = [2, 32], strides = [1, 1]} : vector<2x128xf32> to vector<2x32xf32>
    %119 = vector.extract_strided_slice %114 {offsets = [0, 96], sizes = [2, 32], strides = [1, 1]} : vector<2x128xf32> to vector<2x32xf32>
    %120 = arith.mulf %117, %104 : vector<2x32xf32>
    %121 = arith.mulf %116, %118 : vector<2x32xf32>
    %122 = arith.addf %120, %121 : vector<2x32xf32>
    %123 = math.tanh %122 : vector<2x32xf32>
    %124 = arith.mulf %119, %123 : vector<2x32xf32>
    %125 = vector.extract_strided_slice %12 {offsets = [12, 0], sizes = [2, 128], strides = [1, 1]} : vector<16x128xf32> to vector<2x128xf32>
    %cst_26 = arith.constant dense<0.000000e+00> : vector<2x128xf32>
    %126 = tpu.matmul %124, %13, %cst_26 {dimension_numbers = #tpu.dot_dimension_numbers<[1], [0], [0], [1], [0, 0, 1, 1], [], []>} : vector<2x32xf32>, vector<32x128xf32>, vector<2x128xf32> -> vector<2x128xf32>
    %127 = arith.addf %125, %126 : vector<2x128xf32>
    %128 = arith.negf %127 : vector<2x128xf32>
    %129 = math.exp %128 : vector<2x128xf32>
    %cst_27 = arith.constant 1.000000e+00 : f32
    %130 = vector.broadcast %cst_27 : f32 to vector<2x128xf32>
    %131 = arith.addf %130, %129 : vector<2x128xf32>
    %132 = arith.divf %130, %131 : vector<2x128xf32>
    %133 = math.tanh %127 : vector<2x128xf32>
    %134 = vector.extract_strided_slice %132 {offsets = [0, 0], sizes = [2, 32], strides = [1, 1]} : vector<2x128xf32> to vector<2x32xf32>
    %135 = vector.extract_strided_slice %132 {offsets = [0, 32], sizes = [2, 32], strides = [1, 1]} : vector<2x128xf32> to vector<2x32xf32>
    %136 = vector.extract_strided_slice %133 {offsets = [0, 64], sizes = [2, 32], strides = [1, 1]} : vector<2x128xf32> to vector<2x32xf32>
    %137 = vector.extract_strided_slice %132 {offsets = [0, 96], sizes = [2, 32], strides = [1, 1]} : vector<2x128xf32> to vector<2x32xf32>
    %138 = arith.mulf %135, %122 : vector<2x32xf32>
    %139 = arith.mulf %134, %136 : vector<2x32xf32>
    %140 = arith.addf %138, %139 : vector<2x32xf32>
    %141 = math.tanh %140 : vector<2x32xf32>
    %142 = arith.mulf %137, %141 : vector<2x32xf32>
    %143 = vector.extract_strided_slice %12 {offsets = [14, 0], sizes = [2, 128], strides = [1, 1]} : vector<16x128xf32> to vector<2x128xf32>
    %cst_28 = arith.constant dense<0.000000e+00> : vector<2x128xf32>
    %144 = tpu.matmul %142, %13, %cst_28 {dimension_numbers = #tpu.dot_dimension_numbers<[1], [0], [0], [1], [0, 0, 1, 1], [], []>} : vector<2x32xf32>, vector<32x128xf32>, vector<2x128xf32> -> vector<2x128xf32>
    %145 = arith.addf %143, %144 : vector<2x128xf32>
    %146 = arith.negf %145 : vector<2x128xf32>
    %147 = math.exp %146 : vector<2x128xf32>
    %cst_29 = arith.constant 1.000000e+00 : f32
    %148 = vector.broadcast %cst_29 : f32 to vector<2x128xf32>
    %149 = arith.addf %148, %147 : vector<2x128xf32>
    %150 = arith.divf %148, %149 : vector<2x128xf32>
    %151 = math.tanh %145 : vector<2x128xf32>
    %152 = vector.extract_strided_slice %150 {offsets = [0, 0], sizes = [2, 32], strides = [1, 1]} : vector<2x128xf32> to vector<2x32xf32>
    %153 = vector.extract_strided_slice %150 {offsets = [0, 32], sizes = [2, 32], strides = [1, 1]} : vector<2x128xf32> to vector<2x32xf32>
    %154 = vector.extract_strided_slice %151 {offsets = [0, 64], sizes = [2, 32], strides = [1, 1]} : vector<2x128xf32> to vector<2x32xf32>
    %155 = vector.extract_strided_slice %150 {offsets = [0, 96], sizes = [2, 32], strides = [1, 1]} : vector<2x128xf32> to vector<2x32xf32>
    %156 = arith.mulf %153, %140 : vector<2x32xf32>
    %157 = arith.mulf %152, %154 : vector<2x32xf32>
    %158 = arith.addf %156, %157 : vector<2x32xf32>
    %159 = math.tanh %158 : vector<2x32xf32>
    %160 = arith.mulf %155, %159 : vector<2x32xf32>
    %161 = tpu.concatenate %34, %52, %70, %88, %106, %124, %142, %160 in 0 : vector<2x32xf32>, vector<2x32xf32>, vector<2x32xf32>, vector<2x32xf32>, vector<2x32xf32>, vector<2x32xf32>, vector<2x32xf32>, vector<2x32xf32> -> vector<16x32xf32>
    %c0_30 = arith.constant 0 : index
    %c0_31 = arith.constant 0 : index
    %162 = vector.load %arg5[%c0_30, %c0_31] : memref<32x128xf32, #tpu.memory_space<vmem>>, vector<32x128xf32>
    %cst_32 = arith.constant dense<0.000000e+00> : vector<16x128xf32>
    %163 = tpu.matmul %161, %162, %cst_32 {dimension_numbers = #tpu.dot_dimension_numbers<[1], [0], [0], [1], [0, 0, 1, 1], [], []>} : vector<16x32xf32>, vector<32x128xf32>, vector<16x128xf32> -> vector<16x128xf32>
    %c0_33 = arith.constant 0 : index
    %c0_34 = arith.constant 0 : index
    %164 = vector.load %arg7[%c0_33, %c0_34] : memref<1x128xf32, #tpu.memory_space<vmem>>, vector<1x128xf32>
    %165 = vector.broadcast %164 : vector<1x128xf32> to vector<16x128xf32>
    %166 = arith.addf %163, %165 : vector<16x128xf32>
    %cst_35 = arith.constant 0.000000e+00 : f32
    %167 = vector.broadcast %cst_35 : f32 to vector<2x32xf32>
    %cst_36 = arith.constant 0.000000e+00 : f32
    %168 = vector.broadcast %cst_36 : f32 to vector<2x32xf32>
    %169 = vector.extract_strided_slice %166 {offsets = [0, 0], sizes = [2, 128], strides = [1, 1]} : vector<16x128xf32> to vector<2x128xf32>
    %cst_37 = arith.constant dense<0.000000e+00> : vector<2x128xf32>
    %170 = tpu.matmul %167, %14, %cst_37 {dimension_numbers = #tpu.dot_dimension_numbers<[1], [0], [0], [1], [0, 0, 1, 1], [], []>} : vector<2x32xf32>, vector<32x128xf32>, vector<2x128xf32> -> vector<2x128xf32>
    %171 = arith.addf %169, %170 : vector<2x128xf32>
    %172 = arith.negf %171 : vector<2x128xf32>
    %173 = math.exp %172 : vector<2x128xf32>
    %cst_38 = arith.constant 1.000000e+00 : f32
    %174 = vector.broadcast %cst_38 : f32 to vector<2x128xf32>
    %175 = arith.addf %174, %173 : vector<2x128xf32>
    %176 = arith.divf %174, %175 : vector<2x128xf32>
    %177 = math.tanh %171 : vector<2x128xf32>
    %178 = vector.extract_strided_slice %176 {offsets = [0, 0], sizes = [2, 32], strides = [1, 1]} : vector<2x128xf32> to vector<2x32xf32>
    %179 = vector.extract_strided_slice %176 {offsets = [0, 32], sizes = [2, 32], strides = [1, 1]} : vector<2x128xf32> to vector<2x32xf32>
    %180 = vector.extract_strided_slice %177 {offsets = [0, 64], sizes = [2, 32], strides = [1, 1]} : vector<2x128xf32> to vector<2x32xf32>
    %181 = vector.extract_strided_slice %176 {offsets = [0, 96], sizes = [2, 32], strides = [1, 1]} : vector<2x128xf32> to vector<2x32xf32>
    %182 = arith.mulf %179, %168 : vector<2x32xf32>
    %183 = arith.mulf %178, %180 : vector<2x32xf32>
    %184 = arith.addf %182, %183 : vector<2x32xf32>
    %185 = math.tanh %184 : vector<2x32xf32>
    %186 = arith.mulf %181, %185 : vector<2x32xf32>
    %187 = vector.extract_strided_slice %166 {offsets = [2, 0], sizes = [2, 128], strides = [1, 1]} : vector<16x128xf32> to vector<2x128xf32>
    %cst_39 = arith.constant dense<0.000000e+00> : vector<2x128xf32>
    %188 = tpu.matmul %186, %14, %cst_39 {dimension_numbers = #tpu.dot_dimension_numbers<[1], [0], [0], [1], [0, 0, 1, 1], [], []>} : vector<2x32xf32>, vector<32x128xf32>, vector<2x128xf32> -> vector<2x128xf32>
    %189 = arith.addf %187, %188 : vector<2x128xf32>
    %190 = arith.negf %189 : vector<2x128xf32>
    %191 = math.exp %190 : vector<2x128xf32>
    %cst_40 = arith.constant 1.000000e+00 : f32
    %192 = vector.broadcast %cst_40 : f32 to vector<2x128xf32>
    %193 = arith.addf %192, %191 : vector<2x128xf32>
    %194 = arith.divf %192, %193 : vector<2x128xf32>
    %195 = math.tanh %189 : vector<2x128xf32>
    %196 = vector.extract_strided_slice %194 {offsets = [0, 0], sizes = [2, 32], strides = [1, 1]} : vector<2x128xf32> to vector<2x32xf32>
    %197 = vector.extract_strided_slice %194 {offsets = [0, 32], sizes = [2, 32], strides = [1, 1]} : vector<2x128xf32> to vector<2x32xf32>
    %198 = vector.extract_strided_slice %195 {offsets = [0, 64], sizes = [2, 32], strides = [1, 1]} : vector<2x128xf32> to vector<2x32xf32>
    %199 = vector.extract_strided_slice %194 {offsets = [0, 96], sizes = [2, 32], strides = [1, 1]} : vector<2x128xf32> to vector<2x32xf32>
    %200 = arith.mulf %197, %184 : vector<2x32xf32>
    %201 = arith.mulf %196, %198 : vector<2x32xf32>
    %202 = arith.addf %200, %201 : vector<2x32xf32>
    %203 = math.tanh %202 : vector<2x32xf32>
    %204 = arith.mulf %199, %203 : vector<2x32xf32>
    %205 = vector.extract_strided_slice %166 {offsets = [4, 0], sizes = [2, 128], strides = [1, 1]} : vector<16x128xf32> to vector<2x128xf32>
    %cst_41 = arith.constant dense<0.000000e+00> : vector<2x128xf32>
    %206 = tpu.matmul %204, %14, %cst_41 {dimension_numbers = #tpu.dot_dimension_numbers<[1], [0], [0], [1], [0, 0, 1, 1], [], []>} : vector<2x32xf32>, vector<32x128xf32>, vector<2x128xf32> -> vector<2x128xf32>
    %207 = arith.addf %205, %206 : vector<2x128xf32>
    %208 = arith.negf %207 : vector<2x128xf32>
    %209 = math.exp %208 : vector<2x128xf32>
    %cst_42 = arith.constant 1.000000e+00 : f32
    %210 = vector.broadcast %cst_42 : f32 to vector<2x128xf32>
    %211 = arith.addf %210, %209 : vector<2x128xf32>
    %212 = arith.divf %210, %211 : vector<2x128xf32>
    %213 = math.tanh %207 : vector<2x128xf32>
    %214 = vector.extract_strided_slice %212 {offsets = [0, 0], sizes = [2, 32], strides = [1, 1]} : vector<2x128xf32> to vector<2x32xf32>
    %215 = vector.extract_strided_slice %212 {offsets = [0, 32], sizes = [2, 32], strides = [1, 1]} : vector<2x128xf32> to vector<2x32xf32>
    %216 = vector.extract_strided_slice %213 {offsets = [0, 64], sizes = [2, 32], strides = [1, 1]} : vector<2x128xf32> to vector<2x32xf32>
    %217 = vector.extract_strided_slice %212 {offsets = [0, 96], sizes = [2, 32], strides = [1, 1]} : vector<2x128xf32> to vector<2x32xf32>
    %218 = arith.mulf %215, %202 : vector<2x32xf32>
    %219 = arith.mulf %214, %216 : vector<2x32xf32>
    %220 = arith.addf %218, %219 : vector<2x32xf32>
    %221 = math.tanh %220 : vector<2x32xf32>
    %222 = arith.mulf %217, %221 : vector<2x32xf32>
    %223 = vector.extract_strided_slice %166 {offsets = [6, 0], sizes = [2, 128], strides = [1, 1]} : vector<16x128xf32> to vector<2x128xf32>
    %cst_43 = arith.constant dense<0.000000e+00> : vector<2x128xf32>
    %224 = tpu.matmul %222, %14, %cst_43 {dimension_numbers = #tpu.dot_dimension_numbers<[1], [0], [0], [1], [0, 0, 1, 1], [], []>} : vector<2x32xf32>, vector<32x128xf32>, vector<2x128xf32> -> vector<2x128xf32>
    %225 = arith.addf %223, %224 : vector<2x128xf32>
    %226 = arith.negf %225 : vector<2x128xf32>
    %227 = math.exp %226 : vector<2x128xf32>
    %cst_44 = arith.constant 1.000000e+00 : f32
    %228 = vector.broadcast %cst_44 : f32 to vector<2x128xf32>
    %229 = arith.addf %228, %227 : vector<2x128xf32>
    %230 = arith.divf %228, %229 : vector<2x128xf32>
    %231 = math.tanh %225 : vector<2x128xf32>
    %232 = vector.extract_strided_slice %230 {offsets = [0, 0], sizes = [2, 32], strides = [1, 1]} : vector<2x128xf32> to vector<2x32xf32>
    %233 = vector.extract_strided_slice %230 {offsets = [0, 32], sizes = [2, 32], strides = [1, 1]} : vector<2x128xf32> to vector<2x32xf32>
    %234 = vector.extract_strided_slice %231 {offsets = [0, 64], sizes = [2, 32], strides = [1, 1]} : vector<2x128xf32> to vector<2x32xf32>
    %235 = vector.extract_strided_slice %230 {offsets = [0, 96], sizes = [2, 32], strides = [1, 1]} : vector<2x128xf32> to vector<2x32xf32>
    %236 = arith.mulf %233, %220 : vector<2x32xf32>
    %237 = arith.mulf %232, %234 : vector<2x32xf32>
    %238 = arith.addf %236, %237 : vector<2x32xf32>
    %239 = math.tanh %238 : vector<2x32xf32>
    %240 = arith.mulf %235, %239 : vector<2x32xf32>
    %241 = vector.extract_strided_slice %166 {offsets = [8, 0], sizes = [2, 128], strides = [1, 1]} : vector<16x128xf32> to vector<2x128xf32>
    %cst_45 = arith.constant dense<0.000000e+00> : vector<2x128xf32>
    %242 = tpu.matmul %240, %14, %cst_45 {dimension_numbers = #tpu.dot_dimension_numbers<[1], [0], [0], [1], [0, 0, 1, 1], [], []>} : vector<2x32xf32>, vector<32x128xf32>, vector<2x128xf32> -> vector<2x128xf32>
    %243 = arith.addf %241, %242 : vector<2x128xf32>
    %244 = arith.negf %243 : vector<2x128xf32>
    %245 = math.exp %244 : vector<2x128xf32>
    %cst_46 = arith.constant 1.000000e+00 : f32
    %246 = vector.broadcast %cst_46 : f32 to vector<2x128xf32>
    %247 = arith.addf %246, %245 : vector<2x128xf32>
    %248 = arith.divf %246, %247 : vector<2x128xf32>
    %249 = math.tanh %243 : vector<2x128xf32>
    %250 = vector.extract_strided_slice %248 {offsets = [0, 0], sizes = [2, 32], strides = [1, 1]} : vector<2x128xf32> to vector<2x32xf32>
    %251 = vector.extract_strided_slice %248 {offsets = [0, 32], sizes = [2, 32], strides = [1, 1]} : vector<2x128xf32> to vector<2x32xf32>
    %252 = vector.extract_strided_slice %249 {offsets = [0, 64], sizes = [2, 32], strides = [1, 1]} : vector<2x128xf32> to vector<2x32xf32>
    %253 = vector.extract_strided_slice %248 {offsets = [0, 96], sizes = [2, 32], strides = [1, 1]} : vector<2x128xf32> to vector<2x32xf32>
    %254 = arith.mulf %251, %238 : vector<2x32xf32>
    %255 = arith.mulf %250, %252 : vector<2x32xf32>
    %256 = arith.addf %254, %255 : vector<2x32xf32>
    %257 = math.tanh %256 : vector<2x32xf32>
    %258 = arith.mulf %253, %257 : vector<2x32xf32>
    %259 = vector.extract_strided_slice %166 {offsets = [10, 0], sizes = [2, 128], strides = [1, 1]} : vector<16x128xf32> to vector<2x128xf32>
    %cst_47 = arith.constant dense<0.000000e+00> : vector<2x128xf32>
    %260 = tpu.matmul %258, %14, %cst_47 {dimension_numbers = #tpu.dot_dimension_numbers<[1], [0], [0], [1], [0, 0, 1, 1], [], []>} : vector<2x32xf32>, vector<32x128xf32>, vector<2x128xf32> -> vector<2x128xf32>
    %261 = arith.addf %259, %260 : vector<2x128xf32>
    %262 = arith.negf %261 : vector<2x128xf32>
    %263 = math.exp %262 : vector<2x128xf32>
    %cst_48 = arith.constant 1.000000e+00 : f32
    %264 = vector.broadcast %cst_48 : f32 to vector<2x128xf32>
    %265 = arith.addf %264, %263 : vector<2x128xf32>
    %266 = arith.divf %264, %265 : vector<2x128xf32>
    %267 = math.tanh %261 : vector<2x128xf32>
    %268 = vector.extract_strided_slice %266 {offsets = [0, 0], sizes = [2, 32], strides = [1, 1]} : vector<2x128xf32> to vector<2x32xf32>
    %269 = vector.extract_strided_slice %266 {offsets = [0, 32], sizes = [2, 32], strides = [1, 1]} : vector<2x128xf32> to vector<2x32xf32>
    %270 = vector.extract_strided_slice %267 {offsets = [0, 64], sizes = [2, 32], strides = [1, 1]} : vector<2x128xf32> to vector<2x32xf32>
    %271 = vector.extract_strided_slice %266 {offsets = [0, 96], sizes = [2, 32], strides = [1, 1]} : vector<2x128xf32> to vector<2x32xf32>
    %272 = arith.mulf %269, %256 : vector<2x32xf32>
    %273 = arith.mulf %268, %270 : vector<2x32xf32>
    %274 = arith.addf %272, %273 : vector<2x32xf32>
    %275 = math.tanh %274 : vector<2x32xf32>
    %276 = arith.mulf %271, %275 : vector<2x32xf32>
    %277 = vector.extract_strided_slice %166 {offsets = [12, 0], sizes = [2, 128], strides = [1, 1]} : vector<16x128xf32> to vector<2x128xf32>
    %cst_49 = arith.constant dense<0.000000e+00> : vector<2x128xf32>
    %278 = tpu.matmul %276, %14, %cst_49 {dimension_numbers = #tpu.dot_dimension_numbers<[1], [0], [0], [1], [0, 0, 1, 1], [], []>} : vector<2x32xf32>, vector<32x128xf32>, vector<2x128xf32> -> vector<2x128xf32>
    %279 = arith.addf %277, %278 : vector<2x128xf32>
    %280 = arith.negf %279 : vector<2x128xf32>
    %281 = math.exp %280 : vector<2x128xf32>
    %cst_50 = arith.constant 1.000000e+00 : f32
    %282 = vector.broadcast %cst_50 : f32 to vector<2x128xf32>
    %283 = arith.addf %282, %281 : vector<2x128xf32>
    %284 = arith.divf %282, %283 : vector<2x128xf32>
    %285 = math.tanh %279 : vector<2x128xf32>
    %286 = vector.extract_strided_slice %284 {offsets = [0, 0], sizes = [2, 32], strides = [1, 1]} : vector<2x128xf32> to vector<2x32xf32>
    %287 = vector.extract_strided_slice %284 {offsets = [0, 32], sizes = [2, 32], strides = [1, 1]} : vector<2x128xf32> to vector<2x32xf32>
    %288 = vector.extract_strided_slice %285 {offsets = [0, 64], sizes = [2, 32], strides = [1, 1]} : vector<2x128xf32> to vector<2x32xf32>
    %289 = vector.extract_strided_slice %284 {offsets = [0, 96], sizes = [2, 32], strides = [1, 1]} : vector<2x128xf32> to vector<2x32xf32>
    %290 = arith.mulf %287, %274 : vector<2x32xf32>
    %291 = arith.mulf %286, %288 : vector<2x32xf32>
    %292 = arith.addf %290, %291 : vector<2x32xf32>
    %293 = math.tanh %292 : vector<2x32xf32>
    %294 = arith.mulf %289, %293 : vector<2x32xf32>
    %295 = vector.extract_strided_slice %166 {offsets = [14, 0], sizes = [2, 128], strides = [1, 1]} : vector<16x128xf32> to vector<2x128xf32>
    %cst_51 = arith.constant dense<0.000000e+00> : vector<2x128xf32>
    %296 = tpu.matmul %294, %14, %cst_51 {dimension_numbers = #tpu.dot_dimension_numbers<[1], [0], [0], [1], [0, 0, 1, 1], [], []>} : vector<2x32xf32>, vector<32x128xf32>, vector<2x128xf32> -> vector<2x128xf32>
    %297 = arith.addf %295, %296 : vector<2x128xf32>
    %298 = arith.negf %297 : vector<2x128xf32>
    %299 = math.exp %298 : vector<2x128xf32>
    %cst_52 = arith.constant 1.000000e+00 : f32
    %300 = vector.broadcast %cst_52 : f32 to vector<2x128xf32>
    %301 = arith.addf %300, %299 : vector<2x128xf32>
    %302 = arith.divf %300, %301 : vector<2x128xf32>
    %303 = math.tanh %297 : vector<2x128xf32>
    %304 = vector.extract_strided_slice %302 {offsets = [0, 0], sizes = [2, 32], strides = [1, 1]} : vector<2x128xf32> to vector<2x32xf32>
    %305 = vector.extract_strided_slice %302 {offsets = [0, 32], sizes = [2, 32], strides = [1, 1]} : vector<2x128xf32> to vector<2x32xf32>
    %306 = vector.extract_strided_slice %303 {offsets = [0, 64], sizes = [2, 32], strides = [1, 1]} : vector<2x128xf32> to vector<2x32xf32>
    %307 = vector.extract_strided_slice %302 {offsets = [0, 96], sizes = [2, 32], strides = [1, 1]} : vector<2x128xf32> to vector<2x32xf32>
    %308 = arith.mulf %305, %292 : vector<2x32xf32>
    %309 = arith.mulf %304, %306 : vector<2x32xf32>
    %310 = arith.addf %308, %309 : vector<2x32xf32>
    %311 = math.tanh %310 : vector<2x32xf32>
    %312 = arith.mulf %307, %311 : vector<2x32xf32>
    %c0_53 = arith.constant 0 : index
    %c0_54 = arith.constant 0 : index
    %313 = vector.load %arg8[%c0_53, %c0_54] : memref<32x4xf32, #tpu.memory_space<vmem>>, vector<32x4xf32>
    %cst_55 = arith.constant dense<0.000000e+00> : vector<2x4xf32>
    %314 = tpu.matmul %312, %313, %cst_55 {dimension_numbers = #tpu.dot_dimension_numbers<[1], [0], [0], [1], [0, 0, 1, 1], [], []>} : vector<2x32xf32>, vector<32x4xf32>, vector<2x4xf32> -> vector<2x4xf32>
    %c0_56 = arith.constant 0 : index
    %c0_57 = arith.constant 0 : index
    %315 = vector.load %arg9[%c0_56, %c0_57] : memref<1x4xf32, #tpu.memory_space<vmem>>, vector<1x4xf32>
    %316 = vector.broadcast %315 : vector<1x4xf32> to vector<2x4xf32>
    %317 = arith.addf %314, %316 : vector<2x4xf32>
    %cst_58 = arith.constant dense<0xFF800000> : vector<2xf32>
    %318 = vector.multi_reduction <maximumf>, %317, %cst_58 [1] : vector<2x4xf32> to vector<2xf32>
    %319 = vector.shape_cast %318 : vector<2xf32> to vector<2x1xf32>
    %320 = vector.broadcast %319 : vector<2x1xf32> to vector<2x4xf32>
    %321 = arith.subf %317, %320 : vector<2x4xf32>
    %322 = math.exp %321 : vector<2x4xf32>
    %cst_59 = arith.constant dense<0.000000e+00> : vector<2xf32>
    %323 = vector.multi_reduction <add>, %322, %cst_59 [1] : vector<2x4xf32> to vector<2xf32>
    %324 = vector.shape_cast %323 : vector<2xf32> to vector<2x1xf32>
    %325 = vector.broadcast %324 : vector<2x1xf32> to vector<2x4xf32>
    %326 = arith.divf %322, %325 : vector<2x4xf32>
    %c0_60 = arith.constant 0 : index
    %c0_61 = arith.constant 0 : index
    %327 = vector.load %arg10[%c0_60, %c0_61] : memref<2x4xf32, #tpu.memory_space<vmem>>, vector<2x4xf32>
    tpu.vector_store %arg10[%c0_60, %c0_61], %326 {strides = array<i32>} : memref<2x4xf32, #tpu.memory_space<vmem>>, vector<2x4xf32>,
    return
  }
}

</mosaic_0001>

<bundles_post_ra>
// kernel: tpu_custom_call.1
= control target key start
LH: loop header
LB: loop body
LE: loop exit
PB: predicated region body
PF: predicated region fallthrough
CT: control target
= control target key end

     0   :  { %15 = vsyncpa [#allocation3], 0  ;;  %s3182_s0 = inlined_call_operand.vmem [shape: s32[16,1], index: 0, kind: input, shape index: {}]   ;;  %s3183_s1 = inlined_call_operand.vmem [shape: f32[50,16], index: 1, kind: input, shape index: {}]   ;;  %s3184_s2 = inlined_call_operand.vmem [shape: f32[16,128], index: 2, kind: input, shape index: {}]   ;;  %s3185_s3 = inlined_call_operand.vmem [shape: f32[32,128], index: 3, kind: input, shape index: {}]   ;;  %s3186_s4 = inlined_call_operand.hbm [shape: f32[1,128], index: 4, kind: input, shape index: {}]   ;;  %s3187_s5 = inlined_call_operand.vmem [shape: f32[32,128], index: 5, kind: input, shape index: {}]   ;;  %s3188_s6 = inlined_call_operand.vmem [shape: f32[32,128], index: 6, kind: input, shape index: {}]   ;;  %s3189_s7 = inlined_call_operand.vmem [shape: f32[1,128], index: 7, kind: input, shape index: {}]   ;;  %s3190_s8 = inlined_call_operand.vmem [shape: f32[32,4], index: 8, kind: input, shape index: {}]   ;;  %s3191_s9 = inlined_call_operand.vmem [shape: f32[1,4], index: 9, kind: input, shape index: {}]   ;;  %s3192_s10 = inlined_call_operand.hbm [shape: f32[2,4], index: 10, kind: output, shape index: {}]  }
   0x1   :  { %16 = vsyncpa [#allocation4], 0  ;;  %s2710_s13 = smov [#allocation2]  }
   0x2   :  { %s31_s14 = sshll.u32 %s2710_s13, 4  ;;  %s32_s14 = int_to_ptr.vmem [resolvable:$true] %s31_s14 }
   0x3   :  { %s2674_s15 = scalar_lea.vmem %s32_s14, 16  ;;  %s2678_s16 = scalar_lea.vmem %s32_s14, 32 }
   0x4   :  { %p2675_p0 = scmp.ne.s32.totalorder %s32_s14, %s2674_s15  ;;  %p2679_p1 = scmp.lt.s32.totalorder %s32_s14, %s32_s14 }
   0x5   :  { %p2680_p2 = scmp.lt.s32.totalorder %s2678_s16, %s2674_s15 }
   0x7   :  { %p2681_p3 = por %p2680_p2, %p2679_p1 }
   0x9   :  { %p2682_p4 = pnand %p2681_p3, %p2675_p0 }
   0xb   :  { %2685 = shalt.err (!%p2682_p4)
}
   0xc   :  { %34 = dma.hbm_to_vmem [thread:$0]  %s3186_s4, 16, %s32_s14, [#allocation3]  }
   0xd   :  { %2706 = dma.done.wait [#allocation3], 16  }
   0xe   :  { %2707 = vsyncadd [#allocation3], 4294967280  ;;  %v2711_v0 = vmov 0   ;;  %vm78_vm0 = vcmask 1041408   ;;  %v2712_v1 = vmov 0.0   ;;  %v48_v2 = vld [vmem:[%s3182_s0] sm:$0xff]  ;;  %v50_v13 = vlaneseq }
   0xf   :  { %2533 = vset.pattern.permute.xlu0 %v2711_v0  ;;  %2328 = vmatprep.subr.mxu1 %v2712_v1  ;;  %v70_v3 = vld [vmem:[%s3183_s1 + $0x30] sm:$0x3]  ;;  %v69_v4 = vld [vmem:[%s3183_s1 + $0x28] sm:$0xff]  ;;  %v68_v6 = vld [vmem:[%s3183_s1 + $0x20] sm:$0xff]  ;;  %vm71_vm1 = vcmask 408576   ;;  %vm2713_vm4 = vmmov 0  }
  0x10   :  { %53 = vperm.xlu0 %2533, %v48_v2   ;;  %2304 = vmatprep.subr.msk.mxu0 %vm78_vm0, %v70_v3  ;;  %v49_v5 = vld [vmem:[%s3182_s0 + $0x8] sm:$0xff]  ;;  %v2796_v7 = vld [vmem:[%s3185_s3 + $0x18] sm:$0xff]  ;;  %v66_v9 = vld [vmem:[%s3183_s1 + $0x10] sm:$0xff]  ;;  %v51_v14 = vand.u32 127, %v50_v13  ;;  %vm166_vm5 = vcmask 130048   ;;  %s2715_s24 = smov 32  }
  0x11   :  { %2305 = vmatpush3.msk.msra.mxu0 %vm78_vm0, %v70_v3  ;;  %v67_v8 = vld [vmem:[%s3183_s1 + $0x18] sm:$0xff]  ;;  %2329 = vmatpush3.msra.mxu1 %v2796_v7  ;;  %v65_v10 = vld [vmem:[%s3183_s1 + $0x8] sm:$0xff]  ;;  %v64_v11 = vld [vmem:[%s3183_s1] sm:$0xff]  ;;  %vm256_vm6 = vcmask 261120   ;;  %vm1100_vm7 = vcmask 1043456   ;;  %vm1102_vm8 = vcmask 1045504  }
  0x12   :  { %2306 = vmatprep.subr.mxu0 %v69_v4  ;;  %2330 = vmatprep.subr.mxu1 %v2712_v1  ;;  %v158_v12 = vld [vmem:[%s3184_s2 + $0x8] sm:$0xff]  ;;  %v157_v19 = vld [vmem:[%s3184_s2] sm:$0xff]  ;;  %v2823_v20 = vld [vmem:[%s3185_s3 + $0x10] sm:$0xff]  ;;  %vm2129_vm9 = vcmask 25600  }
  0x13   :  { %2307 = vmatpush3.msra.mxu0 %v69_v4  ;;  %2331 = vmatpush3.msra.mxu1 %v2823_v20  ;;  %v2830_v21 = vld [vmem:[%s3185_s3 + $0x8] sm:$0xff]  ;;  %v2838_v22 = vld [vmem:[%s3185_s3] sm:$0xff]  ;;  %s2714_s3 = smov 64  }
  0x14   :  { %56 = vperm.xlu0 %2533, %v49_v5   ;;  %2308 = vmatprep.subr.mxu0 %v68_v6  ;;  %v2162_v27 = vld [vmem:[#allocation2] ss:$0 sm:$0xff] }
  0x15   :  { %2309 = vmatpush3.msra.mxu0 %v68_v6  ;;  %2332 = vmatprep.subr.mxu1 %v2712_v1 }
  0x16   :  { %2310 = vmatprep.subr.mxu0 %v67_v8  ;;  %2333 = vmatpush3.msra.mxu1 %v2830_v21 }
  0x17   :  { %2311 = vmatpush3.msra.mxu0 %v67_v8  ;;  %2334 = vmatprep.subr.mxu1 %v2712_v1 }
  0x18   :  { %2312 = vmatprep.subr.mxu0 %v66_v9  ;;  %2335 = vmatpush3.msra.mxu1 %v2838_v22 }
  0x19   :  { %2313 = vmatpush3.msra.mxu0 %v66_v9  ;;  %2336 = vmatprep.mubr.msk.f32.mxu1 %vm2713_vm4, %v2712_v1 }
  0x1a   :  { %2314 = vmatprep.subr.mxu0 %v65_v10  ;;  %2337 = vmatmul.mubr.f32.vlgmr.msra.gmra.mxu1 %v2712_v1 }
  0x1b   :  { %2315 = vmatpush3.msra.mxu0 %v65_v10  ;;  %2339 = vmatprep.subr.mxu1 %v2712_v1 }
  0x1c   :  { %2316 = vmatprep.subr.mxu0 %v64_v11  ;;  %2340 = vmatpush3.msra.mxu1 %v2796_v7 }
  0x1d   :  { %2317 = vmatpush3.msra.mxu0 %v64_v11  ;;  %2347 = vmatprep.mubr.msk.f32.mxu1 %vm2713_vm4, %v2712_v1 }
  0x1e   :  { %2321 = vmatprep.subr.mxu0 %v158_v12  ;;  %2341 = vmatprep.subr.mxu1 %v2712_v1 }
  0x1f   :  { %2342 = vmatpush3.msra.mxu1 %v2823_v20 }
  0x20   :  { %2343 = vmatprep.subr.mxu1 %v2712_v1 }
  0x21   :  { %2344 = vmatpush3.msra.mxu1 %v2830_v21 }
  0x22   :  { %2345 = vmatprep.subr.mxu1 %v2712_v1 }
  0x23   :  { %2346 = vmatpush3.msra.mxu1 %v2838_v22 }
  0x24   :  { %2361 = vmatprep.subr.mxu1 %v2712_v1 }
  0x8b   :  { %v54_v15 = vpop.permute.xlu0 %53 }
  0x8c   :  { %vm58_vm2 = vcmp.eq.s32.totalorder %v51_v14, %v54_v15 }
  0x8d   :  { %v2157_v16 = vsel %vm58_vm2, 1.0, %v2712_v1 }
  0x8e   :  { %2318 = vmatprep.mubr.msk.f32.mxu0 %vm71_vm1, %v2157_v16 }
  0x8f   :  { %v57_v17 = vpop.permute.xlu0 %56 }
  0x90   :  { %vm59_vm3 = vcmp.eq.s32.totalorder %v51_v14, %v57_v17 }
  0x91   :  { %v2158_v18 = vsel %vm59_vm3, 1.0, %v2712_v1 }
  0x92   :  { %2319 = vmatmul.mubr.msk.f32.vlgmr.msra.gmra.mxu0 %vm71_vm1, %v2158_v18 }
  0x93   :  { %2322 = vmatpush3.msra.mxu0 %v158_v12 }
  0x94   :  { %2323 = vmatprep.subr.mxu0 %v157_v19 }
  0x95   :  { %2324 = vmatpush3.msra.mxu0 %v157_v19 }
  0x96   :  { %2350 = vmatprep.subr.mxu0 %v2712_v1 }
  0xda   :  { %v326_v25 = vpop.f32.mrf.mxu1 }
  0xdc   :  { %v2338_v26 = vpop.f32.mrf.mxu1 }
 0x152   :  { %v2320_v23 = vpop.f32.mrf.mxu0 }
 0x154   :  { %v148_v24 = vpop.f32.mrf.mxu0 }
 0x155   :  { %2325 = vmatprep.mubr.msk.f32.mxu0 %vm166_vm5, %v148_v24 }
 0x156   :  { %2326 = vmatmul.mubr.msk.f32.vlgmr.msra.gmra.mxu0 %vm166_vm5, %v2320_v23 }
 0x157   :  { %2351 = vmatpush3.msra.mxu0 %v2796_v7  ;;  %2358 = vmatprep.mubr.msk.f32.mxu0 %vm2713_vm4, %v2712_v1 }
 0x158   :  { %2352 = vmatprep.subr.mxu0 %v2712_v1 }
 0x159   :  { %2353 = vmatpush3.msra.mxu0 %v2823_v20 }
 0x15a   :  { %2354 = vmatprep.subr.mxu0 %v2712_v1 }
 0x15b   :  { %2355 = vmatpush3.msra.mxu0 %v2830_v21 }
 0x15c   :  { %2356 = vmatprep.subr.mxu0 %v2712_v1 }
 0x15d   :  { %2357 = vmatpush3.msra.mxu0 %v2838_v22 }
 0x15e   :  { %2372 = vmatprep.subr.mxu0 %v2712_v1 }
 0x216   :  { %v2327_v28 = vpop.f32.mrf.mxu0 }
 0x217   :  { %v2865_v29 = vadd.f32 %v2327_v28, %v2162_v27 }
 0x218   :  { %v239_v30 = vpop.f32.mrf.mxu0 }
 0x219   :  { %v2867_v31 = vadd.f32 %v2162_v27, %v239_v30 }
 0x21b   :  { %v330_v32 = vadd.f32 %v326_v25, %v2867_v31 }
 0x21d   :  { %2534 = vtanh.f32 %v330_v32  ;;  %v2165_v34 = vmul.f32 -1.442695, %v330_v32 }
 0x21f   :  { %2536 = vpow2.f32 %v2165_v34 }
 0x22a   :  { %v2535_v33 = vpop.eup %2534 }
 0x22b   :  { %340 = vrot.lane.b32.xlu1 %v2535_v33, %s2714_s3 }
 0x22c   :  { %v2537_v35 = vpop.eup %2536 }
 0x22d   :  { %v334_v36 = vadd.f32 1.0, %v2537_v35 }
 0x22f   :  { %2538 = vrcp.f32 %v334_v36 }
 0x23c   :  { %v2539_v37 = vpop.eup %2538 }
 0x23d   :  { %v338_v40 = vmul.f32 0.0, %v2539_v37 }
 0x29d   :  { %v341_v38 = vpop.permute.xlu1 %340 }
 0x29e   :  { %v343_v39 = vmul.f32 %v2539_v37, %v341_v38 }
 0x2a0   :  { %345 = vrot.lane.b32.xlu1 %v343_v39, %s2715_s24 }
 0x312   :  { %v346_v41 = vpop.permute.xlu1 %345 }
 0x313   :  { %v348_v42 = vadd.f32 %v346_v41, %v338_v40 }
 0x315   :  { %2540 = vtanh.f32 %v348_v42  ;;  %v442_v58 = vrot.slane %v348_v42, 6 }
 0x322   :  { %v2541_v43 = vpop.eup %2540 }
 0x323   :  { %351 = vrot.lane.b32.xlu0 %v2541_v43, %s2714_s3 }
 0x395   :  { %v352_v44 = vpop.permute.xlu0 %351 }
 0x396   :  { %v2873_v45 = vmul.f32 %v2539_v37, %v352_v44 }
 0x398   :  { %356 = vrot.lane.b32.xlu1 %v2873_v45, %s2715_s24 }
 0x40a   :  { %v357_v46 = vpop.permute.xlu1 %356 }
 0x40b   :  { %2348 = vmatmul.mubr.msk.f32.vlgmr.msra.gmra.mxu1 %vm256_vm6, %v357_v46 }
 0x40c   :  { %2362 = vmatpush3.msra.mxu1 %v2796_v7  ;;  %2369 = vmatprep.mubr.msk.f32.mxu1 %vm2713_vm4, %v2712_v1 }
 0x40d   :  { %2363 = vmatprep.subr.mxu1 %v2712_v1 }
 0x40e   :  { %2364 = vmatpush3.msra.mxu1 %v2823_v20 }
 0x40f   :  { %2365 = vmatprep.subr.mxu1 %v2712_v1 }
 0x410   :  { %2366 = vmatpush3.msra.mxu1 %v2830_v21 }
 0x411   :  { %2367 = vmatprep.subr.mxu1 %v2712_v1 }
 0x412   :  { %2368 = vmatpush3.msra.mxu1 %v2838_v22 }
 0x413   :  { %2383 = vmatprep.subr.mxu1 %v2712_v1 }
 0x4cb   :  { %v426_v47 = vpop.f32.mrf.mxu1 }
 0x4cc   :  { %v431_v48 = vrot.slane %v426_v47, 6 }
 0x4cd   :  { %v2349_v49 = vpop.f32.mrf.mxu1 }
 0x4ce   :  { %v433_v50 = vadd.f32 %v431_v48, %v2867_v31 }
 0x4d0   :  { %2542 = vtanh.f32 %v433_v50  ;;  %v2167_v52 = vmul.f32 -1.442695, %v433_v50 }
 0x4d2   :  { %2544 = vpow2.f32 %v2167_v52 }
 0x4dd   :  { %v2543_v51 = vpop.eup %2542 }
 0x4de   :  { %446 = vrot.lane.b32.xlu0 %v2543_v51, %s2714_s3 }
 0x4df   :  { %v2545_v53 = vpop.eup %2544 }
 0x4e0   :  { %v437_v54 = vadd.f32 1.0, %v2545_v53 }
 0x4e2   :  { %2546 = vrcp.f32 %v437_v54 }
 0x4ef   :  { %v2547_v55 = vpop.eup %2546 }
 0x4f0   :  { %v444_v59 = vmul.f32 %v2547_v55, %v442_v58 }
 0x550   :  { %v447_v56 = vpop.permute.xlu0 %446 }
 0x551   :  { %v449_v57 = vmul.f32 %v2547_v55, %v447_v56 }
 0x553   :  { %451 = vrot.lane.b32.xlu1 %v449_v57, %s2715_s24 }
 0x5c5   :  { %v452_v60 = vpop.permute.xlu1 %451 }
 0x5c6   :  { %v454_v61 = vadd.f32 %v452_v60, %v444_v59 }
 0x5c8   :  { %2548 = vtanh.f32 %v454_v61  ;;  %v549_v16 = vrot.slane %v454_v61, 6 }
 0x5d5   :  { %v2549_v62 = vpop.eup %2548 }
 0x5d6   :  { %457 = vrot.lane.b32.xlu0 %v2549_v62, %s2714_s3 }
 0x648   :  { %v458_v63 = vpop.permute.xlu0 %457 }
 0x649   :  { %v460_v0 = vmul.f32 %v2547_v55, %v458_v63 }
 0x64b   :  { %v462_v2 = vrot.slane %v460_v0, 2  ;;  %v1099_v26 = vsel %vm78_vm0, %v2873_v45, %v460_v0 }
 0x64d   :  { %463 = vrot.lane.b32.xlu1 %v462_v2, %s2715_s24 }
 0x6bf   :  { %v464_v3 = vpop.permute.xlu1 %463 }
 0x6c0   :  { %2359 = vmatmul.mubr.msk.f32.vlgmr.msra.gmra.mxu0 %vm256_vm6, %v464_v3 }
 0x6c1   :  { %2373 = vmatpush3.msra.mxu0 %v2796_v7  ;;  %2380 = vmatprep.mubr.msk.f32.mxu0 %vm2713_vm4, %v2712_v1 }
 0x6c2   :  { %2374 = vmatprep.subr.mxu0 %v2712_v1 }
 0x6c3   :  { %2375 = vmatpush3.msra.mxu0 %v2823_v20 }
 0x6c4   :  { %2376 = vmatprep.subr.mxu0 %v2712_v1 }
 0x6c5   :  { %2377 = vmatpush3.msra.mxu0 %v2830_v21 }
 0x6c6   :  { %2378 = vmatprep.subr.mxu0 %v2712_v1 }
 0x6c7   :  { %2379 = vmatpush3.msra.mxu0 %v2838_v22 }
 0x6c8   :  { %2394 = vmatprep.subr.mxu0 %v2712_v1 }
 0x780   :  { %v533_v4 = vpop.f32.mrf.mxu0 }
 0x781   :  { %v538_v5 = vrot.slane %v533_v4, 4 }
 0x782   :  { %v2360_v6 = vpop.f32.mrf.mxu0 }
 0x783   :  { %v540_v8 = vadd.f32 %v538_v5, %v2867_v31 }
 0x785   :  { %2550 = vtanh.f32 %v540_v8  ;;  %v2169_v10 = vmul.f32 -1.442695, %v540_v8 }
 0x787   :  { %2552 = vpow2.f32 %v2169_v10 }
 0x792   :  { %v2551_v9 = vpop.eup %2550 }
 0x793   :  { %553 = vrot.lane.b32.xlu0 %v2551_v9, %s2714_s3 }
 0x794   :  { %v2553_v11 = vpop.eup %2552 }
 0x795   :  { %v544_v12 = vadd.f32 1.0, %v2553_v11 }
 0x797   :  { %2554 = vrcp.f32 %v544_v12 }
 0x7a4   :  { %v2555_v13 = vpop.eup %2554 }
 0x7a5   :  { %v551_v17 = vmul.f32 %v2555_v13, %v549_v16 }
 0x805   :  { %v554_v14 = vpop.permute.xlu0 %553 }
 0x806   :  { %v556_v15 = vmul.f32 %v2555_v13, %v554_v14 }
 0x808   :  { %558 = vrot.lane.b32.xlu1 %v556_v15, %s2715_s24 }
 0x87a   :  { %v559_v18 = vpop.permute.xlu1 %558 }
 0x87b   :  { %v561_v19 = vadd.f32 %v559_v18, %v551_v17 }
 0x87d   :  { %2556 = vtanh.f32 %v561_v19  ;;  %v656_v43 = vrot.slane %v561_v19, 6 }
 0x88a   :  { %v2557_v23 = vpop.eup %2556 }
 0x88b   :  { %564 = vrot.lane.b32.xlu0 %v2557_v23, %s2714_s3 }
 0x8fd   :  { %v565_v24 = vpop.permute.xlu0 %564 }
 0x8fe   :  { %v567_v25 = vmul.f32 %v2555_v13, %v565_v24 }
 0x900   :  { %v569_v27 = vrot.slane %v567_v25, 4  ;;  %v1101_v28 = vsel %vm1100_vm7, %v1099_v26, %v567_v25 }
 0x902   :  { %570 = vrot.lane.b32.xlu1 %v569_v27, %s2715_s24 }
 0x974   :  { %v571_v30 = vpop.permute.xlu1 %570 }
 0x975   :  { %2370 = vmatmul.mubr.msk.f32.vlgmr.msra.gmra.mxu1 %vm256_vm6, %v571_v30 }
 0x976   :  { %2384 = vmatpush3.msra.mxu1 %v2796_v7  ;;  %2391 = vmatprep.mubr.msk.f32.mxu1 %vm2713_vm4, %v2712_v1 }
 0x977   :  { %2385 = vmatprep.subr.mxu1 %v2712_v1 }
 0x978   :  { %2386 = vmatpush3.msra.mxu1 %v2823_v20 }
 0x979   :  { %2387 = vmatprep.subr.mxu1 %v2712_v1 }
 0x97a   :  { %2388 = vmatpush3.msra.mxu1 %v2830_v21 }
 0x97b   :  { %2389 = vmatprep.subr.mxu1 %v2712_v1 }
 0x97c   :  { %2390 = vmatpush3.msra.mxu1 %v2838_v22 }
 0x97d   :  { %2405 = vmatprep.subr.mxu1 %v2712_v1 }
 0xa35   :  { %v640_v32 = vpop.f32.mrf.mxu1 }
 0xa36   :  { %v645_v33 = vrot.slane %v640_v32, 2 }
 0xa37   :  { %v2371_v34 = vpop.f32.mrf.mxu1 }
 0xa38   :  { %v647_v35 = vadd.f32 %v645_v33, %v2867_v31 }
 0xa3a   :  { %2558 = vtanh.f32 %v647_v35  ;;  %v2171_v37 = vmul.f32 -1.442695, %v647_v35 }
 0xa3c   :  { %2560 = vpow2.f32 %v2171_v37 }
 0xa47   :  { %v2559_v36 = vpop.eup %2558 }
 0xa48   :  { %660 = vrot.lane.b32.xlu0 %v2559_v36, %s2714_s3 }
 0xa49   :  { %v2561_v38 = vpop.eup %2560 }
 0xa4a   :  { %v651_v39 = vadd.f32 1.0, %v2561_v38 }
 0xa4c   :  { %2562 = vrcp.f32 %v651_v39 }
 0xa59   :  { %v2563_v40 = vpop.eup %2562 }
 0xa5a   :  { %v658_v44 = vmul.f32 %v2563_v40, %v656_v43 }
 0xaba   :  { %v661_v41 = vpop.permute.xlu0 %660 }
 0xabb   :  { %v663_v42 = vmul.f32 %v2563_v40, %v661_v41 }
 0xabd   :  { %665 = vrot.lane.b32.xlu1 %v663_v42, %s2715_s24 }
 0xb2f   :  { %v666_v45 = vpop.permute.xlu1 %665 }
 0xb30   :  { %v668_v46 = vadd.f32 %v666_v45, %v658_v44 }
 0xb32   :  { %2564 = vtanh.f32 %v668_v46  ;;  %v760_v62 = vrot.slane %v668_v46, 6 }
 0xb3f   :  { %v2565_v31 = vpop.eup %2564 }
 0xb40   :  { %671 = vrot.lane.b32.xlu0 %v2565_v31, %s2714_s3 }
 0xbb2   :  { %v672_v47 = vpop.permute.xlu0 %671 }
 0xbb3   :  { %v674_v48 = vmul.f32 %v2563_v40, %v672_v47 }
 0xbb5   :  { %v676_v49 = vrot.slane %v674_v48, 6  ;;  %v2928_v50 = vsel %vm1102_vm8, %v1101_v28, %v674_v48 }
 0xbb7   :  { %677 = vrot.lane.b32.xlu1 %v676_v49, %s2715_s24 }
 0xc29   :  { %v678_v51 = vpop.permute.xlu1 %677 }
 0xc2a   :  { %2381 = vmatmul.mubr.msk.f32.vlgmr.msra.gmra.mxu0 %vm256_vm6, %v678_v51 }
 0xc2b   :  { %2395 = vmatpush3.msra.mxu0 %v2796_v7  ;;  %2402 = vmatprep.mubr.msk.f32.mxu0 %vm2713_vm4, %v2712_v1 }
 0xc2c   :  { %2396 = vmatprep.subr.mxu0 %v2712_v1 }
 0xc2d   :  { %2397 = vmatpush3.msra.mxu0 %v2823_v20 }
 0xc2e   :  { %2398 = vmatprep.subr.mxu0 %v2712_v1 }
 0xc2f   :  { %2399 = vmatpush3.msra.mxu0 %v2830_v21 }
 0xc30   :  { %2400 = vmatprep.subr.mxu0 %v2712_v1 }
 0xc31   :  { %2401 = vmatpush3.msra.mxu0 %v2838_v22 }
 0xcea   :  { %v747_v52 = vpop.f32.mrf.mxu0 }
 0xceb   :  { %v751_v53 = vadd.f32 %v747_v52, %v2865_v29 }
 0xcec   :  { %v2382_v54 = vpop.f32.mrf.mxu0 }
 0xced   :  { %2566 = vtanh.f32 %v751_v53  ;;  %v2173_v56 = vmul.f32 -1.442695, %v751_v53 }
 0xcef   :  { %2568 = vpow2.f32 %v2173_v56 }
 0xcfa   :  { %v2567_v55 = vpop.eup %2566 }
 0xcfb   :  { %764 = vrot.lane.b32.xlu0 %v2567_v55, %s2714_s3 }
 0xcfc   :  { %v2569_v57 = vpop.eup %2568 }
 0xcfd   :  { %v755_v58 = vadd.f32 1.0, %v2569_v57 }
 0xcff   :  { %2570 = vrcp.f32 %v755_v58 }
 0xd0c   :  { %v2571_v59 = vpop.eup %2570 }
 0xd0d   :  { %v762_v63 = vmul.f32 %v2571_v59, %v760_v62 }
 0xd6d   :  { %v765_v60 = vpop.permute.xlu0 %764 }
 0xd6e   :  { %v767_v61 = vmul.f32 %v2571_v59, %v765_v60 }
 0xd70   :  { %769 = vrot.lane.b32.xlu1 %v767_v61, %s2715_s24 }
 0xde2   :  { %v770_v0 = vpop.permute.xlu1 %769 }
 0xde3   :  { %v772_v2 = vadd.f32 %v770_v0, %v762_v63 }
 0xde5   :  { %2572 = vtanh.f32 %v772_v2 }
 0xdf2   :  { %v2573_v3 = vpop.eup %2572 }
 0xdf3   :  { %775 = vrot.lane.b32.xlu0 %v2573_v3, %s2714_s3  ;;  %v1110_v3 = vld [vmem:[%s3187_s5 + $0x18] sm:$0xff] }
 0xdf4   :  { %2416 = vmatprep.subr.mxu0 %v1110_v3 }
 0xe65   :  { %v776_v4 = vpop.permute.xlu0 %775 }
 0xe66   :  { %v2945_v5 = vmul.f32 %v2571_v59, %v776_v4  ;;  %v1109_v4 = vld [vmem:[%s3187_s5 + $0x10] sm:$0xff] }
 0xe68   :  { %780 = vrot.lane.b32.xlu1 %v2945_v5, %s2715_s24 }
 0xeda   :  { %v781_v6 = vpop.permute.xlu1 %780 }
 0xedb   :  { %2392 = vmatmul.mubr.msk.f32.vlgmr.msra.gmra.mxu1 %vm256_vm6, %v781_v6  ;;  %v1108_v6 = vld [vmem:[%s3187_s5 + $0x8] sm:$0xff] }
 0xedc   :  { %2406 = vmatpush3.msra.mxu1 %v2796_v7  ;;  %2413 = vmatprep.mubr.msk.f32.mxu1 %vm2713_vm4, %v2712_v1 }
 0xedd   :  { %2407 = vmatprep.subr.mxu1 %v2712_v1 }
 0xede   :  { %2408 = vmatpush3.msra.mxu1 %v2823_v20 }
 0xedf   :  { %2409 = vmatprep.subr.mxu1 %v2712_v1 }
 0xee0   :  { %2410 = vmatpush3.msra.mxu1 %v2830_v21 }
 0xee1   :  { %2411 = vmatprep.subr.mxu1 %v2712_v1 }
 0xee2   :  { %2412 = vmatpush3.msra.mxu1 %v2838_v22  ;;  %v866_v22 = vrot.slane %v772_v2, 6 }
 0xee3   :  { %2427 = vmatprep.subr.mxu1 %v2712_v1 }
 0xf9b   :  { %v850_v8 = vpop.f32.mrf.mxu1 }
 0xf9c   :  { %v855_v9 = vrot.slane %v850_v8, 6  ;;  %v3009_v8 = vld [vmem:[%s3188_s6 + $0x8] sm:$0xff] }
 0xf9d   :  { %v2393_v7 = vpop.f32.mrf.mxu1 }
 0xf9e   :  { %v857_v10 = vadd.f32 %v855_v9, %v2865_v29  ;;  %v1107_v9 = vld [vmem:[%s3187_s5] sm:$0xff] }
 0xfa0   :  { %2574 = vtanh.f32 %v857_v10  ;;  %v2175_v20 = vmul.f32 -1.442695, %v857_v10  ;;  %v3023_v10 = vld [vmem:[%s3188_s6] sm:$0xff] }
 0xfa2   :  { %2576 = vpow2.f32 %v2175_v20 }
 0xfad   :  { %v2575_v11 = vpop.eup %2574 }
 0xfae   :  { %870 = vrot.lane.b32.xlu0 %v2575_v11, %s2714_s3 }
 0xfaf   :  { %v2577_v12 = vpop.eup %2576 }
 0xfb0   :  { %v861_v13 = vadd.f32 1.0, %v2577_v12 }
 0xfb2   :  { %2578 = vrcp.f32 %v861_v13 }
 0xfbf   :  { %v2579_v21 = vpop.eup %2578 }
 0xfc0   :  { %v868_v16 = vmul.f32 %v2579_v21, %v866_v22 }
0x1020   :  { %v871_v14 = vpop.permute.xlu0 %870 }
0x1021   :  { %v873_v15 = vmul.f32 %v2579_v21, %v871_v14 }
0x1023   :  { %875 = vrot.lane.b32.xlu1 %v873_v15, %s2715_s24  ;;  %v2180_v15 = vld [vmem:[%s3189_s7] ss:$0 sm:$0xff] }
0x1095   :  { %v876_v17 = vpop.permute.xlu1 %875 }
0x1096   :  { %v878_v18 = vadd.f32 %v876_v17, %v868_v16 }
0x1098   :  { %2580 = vtanh.f32 %v878_v18  ;;  %v973_v40 = vrot.slane %v878_v18, 6 }
0x10a5   :  { %v2581_v19 = vpop.eup %2580 }
0x10a6   :  { %881 = vrot.lane.b32.xlu0 %v2581_v19, %s2714_s3 }
0x1118   :  { %v882_v23 = vpop.permute.xlu0 %881 }
0x1119   :  { %v884_v24 = vmul.f32 %v2579_v21, %v882_v23 }
0x111b   :  { %v886_v25 = vrot.slane %v884_v24, 2  ;;  %v1104_v31 = vsel %vm78_vm0, %v2945_v5, %v884_v24  ;;  %v3000_v5 = vld [vmem:[%s3188_s6 + $0x10] sm:$0xff] }
0x111d   :  { %887 = vrot.lane.b32.xlu1 %v886_v25, %s2715_s24 }
0x118f   :  { %v888_v26 = vpop.permute.xlu1 %887 }
0x1190   :  { %2403 = vmatmul.mubr.msk.f32.vlgmr.msra.gmra.mxu0 %vm256_vm6, %v888_v26 }
0x1191   :  { %2417 = vmatpush3.msra.mxu0 %v1110_v3 }
0x1192   :  { %2418 = vmatprep.subr.mxu0 %v1109_v4 }
0x1193   :  { %2419 = vmatpush3.msra.mxu0 %v1109_v4 }
0x1194   :  { %2420 = vmatprep.subr.mxu0 %v1108_v6 }
0x1195   :  { %2421 = vmatpush3.msra.mxu0 %v1108_v6 }
0x1196   :  { %2422 = vmatprep.subr.mxu0 %v1107_v9 }
0x1197   :  { %2423 = vmatpush3.msra.mxu0 %v1107_v9 }
0x1198   :  { %2438 = vmatprep.subr.mxu0 %v2712_v1 }
0x1250   :  { %v957_v27 = vpop.f32.mrf.mxu0 }
0x1251   :  { %v962_v28 = vrot.slane %v957_v27, 4 }
0x1252   :  { %v2404_v30 = vpop.f32.mrf.mxu0 }
0x1253   :  { %v964_v32 = vadd.f32 %v962_v28, %v2865_v29 }
0x1255   :  { %2582 = vtanh.f32 %v964_v32  ;;  %v2177_v34 = vmul.f32 -1.442695, %v964_v32 }
0x1257   :  { %2584 = vpow2.f32 %v2177_v34 }
0x1262   :  { %v2583_v33 = vpop.eup %2582 }
0x1263   :  { %977 = vrot.lane.b32.xlu0 %v2583_v33, %s2714_s3 }
0x1264   :  { %v2585_v35 = vpop.eup %2584 }
0x1265   :  { %v968_v36 = vadd.f32 1.0, %v2585_v35 }
0x1267   :  { %2586 = vrcp.f32 %v968_v36 }
0x1274   :  { %v2587_v37 = vpop.eup %2586 }
0x1275   :  { %v975_v41 = vmul.f32 %v2587_v37, %v973_v40 }
0x12d5   :  { %v978_v38 = vpop.permute.xlu0 %977 }
0x12d6   :  { %v980_v39 = vmul.f32 %v2587_v37, %v978_v38 }
0x12d8   :  { %982 = vrot.lane.b32.xlu1 %v980_v39, %s2715_s24 }
0x134a   :  { %v983_v42 = vpop.permute.xlu1 %982 }
0x134b   :  { %v985_v43 = vadd.f32 %v983_v42, %v975_v41 }
0x134d   :  { %2588 = vtanh.f32 %v985_v43  ;;  %v1080_v62 = vrot.slane %v985_v43, 6 }
0x135a   :  { %v2589_v44 = vpop.eup %2588 }
0x135b   :  { %988 = vrot.lane.b32.xlu0 %v2589_v44, %s2714_s3 }
0x13cd   :  { %v989_v45 = vpop.permute.xlu0 %988 }
0x13ce   :  { %v991_v46 = vmul.f32 %v2587_v37, %v989_v45 }
0x13d0   :  { %v993_v47 = vrot.slane %v991_v46, 4  ;;  %v2973_v48 = vsel %vm1100_vm7, %v1104_v31, %v991_v46 }
0x13d2   :  { %994 = vrot.lane.b32.xlu1 %v993_v47, %s2715_s24 }
0x1444   :  { %v995_v49 = vpop.permute.xlu1 %994 }
0x1445   :  { %2414 = vmatmul.mubr.msk.f32.vlgmr.msra.gmra.mxu1 %vm256_vm6, %v995_v49 }
0x1446   :  { %2435 = vmatprep.mubr.msk.f32.mxu1 %vm2713_vm4, %v2712_v1 }
0x1505   :  { %v1064_v51 = vpop.f32.mrf.mxu1 }
0x1506   :  { %v1069_v52 = vrot.slane %v1064_v51, 2 }
0x1507   :  { %v2415_v53 = vpop.f32.mrf.mxu1 }
0x1508   :  { %v1071_v54 = vadd.f32 %v1069_v52, %v2865_v29 }
0x150a   :  { %2590 = vtanh.f32 %v1071_v54  ;;  %v2179_v56 = vmul.f32 -1.442695, %v1071_v54 }
0x150c   :  { %2592 = vpow2.f32 %v2179_v56 }
0x1517   :  { %v2591_v55 = vpop.eup %2590 }
0x1518   :  { %1084 = vrot.lane.b32.xlu0 %v2591_v55, %s2714_s3 }
0x1519   :  { %v2593_v57 = vpop.eup %2592 }
0x151a   :  { %v1075_v58 = vadd.f32 1.0, %v2593_v57 }
0x151c   :  { %2594 = vrcp.f32 %v1075_v58 }
0x1529   :  { %v2595_v59 = vpop.eup %2594 }
0x152a   :  { %v1082_v63 = vmul.f32 %v2595_v59, %v1080_v62 }
0x158a   :  { %v1085_v60 = vpop.permute.xlu0 %1084 }
0x158b   :  { %v1087_v61 = vmul.f32 %v2595_v59, %v1085_v60 }
0x158d   :  { %1089 = vrot.lane.b32.xlu1 %v1087_v61, %s2715_s24 }
0x1591   :  { %1120 = vrot.lane.b32.xlu1 %v2928_v50, %s2715_s24  ;;  %v2994_v50 = vld [vmem:[%s3188_s6 + $0x18] sm:$0xff] }
0x1592   :  { %2428 = vmatpush3.msra.mxu1 %v2994_v50 }
0x1593   :  { %2429 = vmatprep.subr.mxu1 %v2712_v1 }
0x1594   :  { %2430 = vmatpush3.msra.mxu1 %v3000_v5 }
0x1595   :  { %2431 = vmatprep.subr.mxu1 %v2712_v1 }
0x1596   :  { %2432 = vmatpush3.msra.mxu1 %v3009_v8 }
0x1597   :  { %2433 = vmatprep.subr.mxu1 %v2712_v1 }
0x1598   :  { %2434 = vmatpush3.msra.mxu1 %v3023_v10 }
0x1599   :  { %2436 = vmatmul.mubr.f32.vlgmr.msra.gmra.mxu1 %v2712_v1  ;;  %2449 = vmatprep.subr.mxu1 %v2712_v1 }
0x159a   :  { %2450 = vmatpush3.msra.mxu1 %v2994_v50  ;;  %2457 = vmatprep.mubr.msk.f32.mxu1 %vm2713_vm4, %v2712_v1 }
0x159b   :  { %2451 = vmatprep.subr.mxu1 %v2712_v1 }
0x159c   :  { %2452 = vmatpush3.msra.mxu1 %v3000_v5 }
0x159d   :  { %2453 = vmatprep.subr.mxu1 %v2712_v1 }
0x159e   :  { %2454 = vmatpush3.msra.mxu1 %v3009_v8 }
0x159f   :  { %2455 = vmatprep.subr.mxu1 %v2712_v1 }
0x15a0   :  { %2456 = vmatpush3.msra.mxu1 %v3023_v10 }
0x15a1   :  { %2471 = vmatprep.subr.mxu1 %v2712_v1 }
0x15ff   :  { %v1090_v29 = vpop.permute.xlu1 %1089 }
0x1600   :  { %v1092_v0 = vadd.f32 %v1090_v29, %v1082_v63 }
0x1602   :  { %2596 = vtanh.f32 %v1092_v0 }
0x1603   :  { %v1121_v2 = vpop.permute.xlu1 %1120 }
0x1604   :  { %2424 = vmatprep.mubr.msk.f32.mxu0 %vm256_vm6, %v1121_v2 }
0x160f   :  { %v2597_v7 = vpop.eup %2596 }
0x1610   :  { %1095 = vrot.lane.b32.xlu0 %v2597_v7, %s2714_s3 }
0x1659   :  { %v1269_v21 = vpop.f32.mrf.mxu1 }
0x165b   :  { %v2437_v14 = vpop.f32.mrf.mxu1 }
0x1682   :  { %v1096_v11 = vpop.permute.xlu0 %1095 }
0x1683   :  { %v1098_v20 = vmul.f32 %v2595_v59, %v1096_v11 }
0x1685   :  { %v1106_v12 = vsel %vm1102_vm8, %v2973_v48, %v1098_v20 }
0x1686   :  { %1122 = vrot.lane.b32.xlu0 %v1106_v12, %s2715_s24 }
0x16f8   :  { %v1123_v13 = vpop.permute.xlu0 %1122 }
0x16f9   :  { %2425 = vmatmul.mubr.msk.f32.vlgmr.msra.gmra.mxu0 %vm256_vm6, %v1123_v13 }
0x16fa   :  { %2439 = vmatpush3.msra.mxu0 %v2994_v50  ;;  %2446 = vmatprep.mubr.msk.f32.mxu0 %vm2713_vm4, %v2712_v1 }
0x16fb   :  { %2440 = vmatprep.subr.mxu0 %v2712_v1 }
0x16fc   :  { %2441 = vmatpush3.msra.mxu0 %v3000_v5 }
0x16fd   :  { %2442 = vmatprep.subr.mxu0 %v2712_v1 }
0x16fe   :  { %2443 = vmatpush3.msra.mxu0 %v3009_v8 }
0x16ff   :  { %2444 = vmatprep.subr.mxu0 %v2712_v1 }
0x1700   :  { %2445 = vmatpush3.msra.mxu0 %v3023_v10 }
0x1701   :  { %2460 = vmatprep.subr.mxu0 %v2712_v1 }
0x17b9   :  { %v2426_v22 = vpop.f32.mrf.mxu0 }
0x17ba   :  { %v3055_v16 = vadd.f32 %v2426_v22, %v2180_v15 }
0x17bb   :  { %v1194_v17 = vpop.f32.mrf.mxu0 }
0x17bc   :  { %v3057_v18 = vadd.f32 %v2180_v15, %v1194_v17 }
0x17be   :  { %v1273_v19 = vadd.f32 %v1269_v21, %v3057_v18 }
0x17c0   :  { %2598 = vtanh.f32 %v1273_v19  ;;  %v2183_v24 = vmul.f32 -1.442695, %v1273_v19 }
0x17c2   :  { %2600 = vpow2.f32 %v2183_v24 }
0x17cd   :  { %v2599_v23 = vpop.eup %2598 }
0x17ce   :  { %1283 = vrot.lane.b32.xlu1 %v2599_v23, %s2714_s3 }
0x17cf   :  { %v2601_v25 = vpop.eup %2600 }
0x17d0   :  { %v1277_v26 = vadd.f32 1.0, %v2601_v25 }
0x17d2   :  { %2602 = vrcp.f32 %v1277_v26 }
0x17df   :  { %v2603_v27 = vpop.eup %2602 }
0x17e0   :  { %v1281_v32 = vmul.f32 0.0, %v2603_v27 }
0x1840   :  { %v1284_v28 = vpop.permute.xlu1 %1283 }
0x1841   :  { %v1286_v30 = vmul.f32 %v2603_v27, %v1284_v28 }
0x1843   :  { %1288 = vrot.lane.b32.xlu0 %v1286_v30, %s2715_s24 }
0x18b5   :  { %v1289_v33 = vpop.permute.xlu0 %1288 }
0x18b6   :  { %v1291_v34 = vadd.f32 %v1289_v33, %v1281_v32 }
0x18b8   :  { %2604 = vtanh.f32 %v1291_v34  ;;  %v1385_v49 = vrot.slane %v1291_v34, 6 }
0x18c5   :  { %v2605_v35 = vpop.eup %2604 }
0x18c6   :  { %1294 = vrot.lane.b32.xlu1 %v2605_v35, %s2714_s3 }
0x1938   :  { %v1295_v36 = vpop.permute.xlu1 %1294 }
0x1939   :  { %v1297_v37 = vmul.f32 %v2603_v27, %v1295_v36 }
0x193b   :  { %1299 = vrot.lane.b32.xlu0 %v1297_v37, %s2715_s24 }
0x19ad   :  { %v1300_v38 = vpop.permute.xlu0 %1299 }
0x19ae   :  { %2447 = vmatmul.mubr.msk.f32.vlgmr.msra.gmra.mxu0 %vm256_vm6, %v1300_v38 }
0x19af   :  { %2461 = vmatpush3.msra.mxu0 %v2994_v50  ;;  %2468 = vmatprep.mubr.msk.f32.mxu0 %vm2713_vm4, %v2712_v1 }
0x19b0   :  { %2462 = vmatprep.subr.mxu0 %v2712_v1 }
0x19b1   :  { %2463 = vmatpush3.msra.mxu0 %v3000_v5 }
0x19b2   :  { %2464 = vmatprep.subr.mxu0 %v2712_v1 }
0x19b3   :  { %2465 = vmatpush3.msra.mxu0 %v3009_v8 }
0x19b4   :  { %2466 = vmatprep.subr.mxu0 %v2712_v1 }
0x19b5   :  { %2467 = vmatpush3.msra.mxu0 %v3023_v10 }
0x19b6   :  { %2482 = vmatprep.subr.mxu0 %v2712_v1 }
0x1a6e   :  { %v1369_v39 = vpop.f32.mrf.mxu0 }
0x1a6f   :  { %v1374_v40 = vrot.slane %v1369_v39, 6 }
0x1a70   :  { %v2448_v41 = vpop.f32.mrf.mxu0 }
0x1a71   :  { %v1376_v42 = vadd.f32 %v1374_v40, %v3057_v18 }
0x1a73   :  { %2606 = vtanh.f32 %v1376_v42  ;;  %v2185_v44 = vmul.f32 -1.442695, %v1376_v42 }
0x1a75   :  { %2608 = vpow2.f32 %v2185_v44 }
0x1a80   :  { %v2607_v43 = vpop.eup %2606 }
0x1a81   :  { %1389 = vrot.lane.b32.xlu1 %v2607_v43, %s2714_s3 }
0x1a82   :  { %v2609_v45 = vpop.eup %2608 }
0x1a83   :  { %v1380_v46 = vadd.f32 1.0, %v2609_v45 }
0x1a85   :  { %2610 = vrcp.f32 %v1380_v46 }
0x1a92   :  { %v2611_v31 = vpop.eup %2610 }
0x1a93   :  { %v1387_v51 = vmul.f32 %v2611_v31, %v1385_v49 }
0x1af3   :  { %v1390_v47 = vpop.permute.xlu1 %1389 }
0x1af4   :  { %v1392_v48 = vmul.f32 %v2611_v31, %v1390_v47 }
0x1af6   :  { %1394 = vrot.lane.b32.xlu0 %v1392_v48, %s2715_s24 }
0x1b68   :  { %v1395_v52 = vpop.permute.xlu0 %1394 }
0x1b69   :  { %v1397_v53 = vadd.f32 %v1395_v52, %v1387_v51 }
0x1b6b   :  { %2612 = vtanh.f32 %v1397_v53  ;;  %v1492_v9 = vrot.slane %v1397_v53, 6 }
0x1b78   :  { %v2613_v54 = vpop.eup %2612 }
0x1b79   :  { %1400 = vrot.lane.b32.xlu1 %v2613_v54, %s2714_s3 }
0x1beb   :  { %v1401_v55 = vpop.permute.xlu1 %1400 }
0x1bec   :  { %v1403_v56 = vmul.f32 %v2611_v31, %v1401_v55 }
0x1bee   :  { %v1405_v57 = vrot.slane %v1403_v56, 2 }
0x1bf0   :  { %1406 = vrot.lane.b32.xlu0 %v1405_v57, %s2715_s24 }
0x1c62   :  { %v1407_v58 = vpop.permute.xlu0 %1406 }
0x1c63   :  { %2458 = vmatmul.mubr.msk.f32.vlgmr.msra.gmra.mxu1 %vm256_vm6, %v1407_v58 }
0x1c64   :  { %2472 = vmatpush3.msra.mxu1 %v2994_v50  ;;  %2479 = vmatprep.mubr.msk.f32.mxu1 %vm2713_vm4, %v2712_v1 }
0x1c65   :  { %2473 = vmatprep.subr.mxu1 %v2712_v1 }
0x1c66   :  { %2474 = vmatpush3.msra.mxu1 %v3000_v5 }
0x1c67   :  { %2475 = vmatprep.subr.mxu1 %v2712_v1 }
0x1c68   :  { %2476 = vmatpush3.msra.mxu1 %v3009_v8 }
0x1c69   :  { %2477 = vmatprep.subr.mxu1 %v2712_v1 }
0x1c6a   :  { %2478 = vmatpush3.msra.mxu1 %v3023_v10 }
0x1c6b   :  { %2493 = vmatprep.subr.mxu1 %v2712_v1 }
0x1d23   :  { %v1476_v59 = vpop.f32.mrf.mxu1 }
0x1d24   :  { %v1481_v60 = vrot.slane %v1476_v59, 4 }
0x1d25   :  { %v2459_v61 = vpop.f32.mrf.mxu1 }
0x1d26   :  { %v1483_v62 = vadd.f32 %v1481_v60, %v3057_v18 }
0x1d28   :  { %2614 = vtanh.f32 %v1483_v62  ;;  %v2187_v29 = vmul.f32 -1.442695, %v1483_v62 }
0x1d2a   :  { %2616 = vpow2.f32 %v2187_v29 }
0x1d35   :  { %v2615_v63 = vpop.eup %2614 }
0x1d36   :  { %1496 = vrot.lane.b32.xlu1 %v2615_v63, %s2714_s3 }
0x1d37   :  { %v2617_v0 = vpop.eup %2616 }
0x1d38   :  { %v1487_v2 = vadd.f32 1.0, %v2617_v0 }
0x1d3a   :  { %2618 = vrcp.f32 %v1487_v2 }
0x1d47   :  { %v2619_v3 = vpop.eup %2618 }
0x1d48   :  { %v1494_v7 = vmul.f32 %v2619_v3, %v1492_v9 }
0x1da8   :  { %v1497_v4 = vpop.permute.xlu1 %1496 }
0x1da9   :  { %v1499_v6 = vmul.f32 %v2619_v3, %v1497_v4 }
0x1dab   :  { %1501 = vrot.lane.b32.xlu0 %v1499_v6, %s2715_s24 }
0x1e1d   :  { %v1502_v11 = vpop.permute.xlu0 %1501 }
0x1e1e   :  { %v1504_v20 = vadd.f32 %v1502_v11, %v1494_v7 }
0x1e20   :  { %2620 = vtanh.f32 %v1504_v20  ;;  %v1599_v33 = vrot.slane %v1504_v20, 6 }
0x1e2d   :  { %v2621_v12 = vpop.eup %2620 }
0x1e2e   :  { %1507 = vrot.lane.b32.xlu1 %v2621_v12, %s2714_s3 }
0x1ea0   :  { %v1508_v13 = vpop.permute.xlu1 %1507 }
0x1ea1   :  { %v1510_v21 = vmul.f32 %v2619_v3, %v1508_v13 }
0x1ea3   :  { %v1512_v14 = vrot.slane %v1510_v21, 4 }
0x1ea5   :  { %1513 = vrot.lane.b32.xlu0 %v1512_v14, %s2715_s24 }
0x1f17   :  { %v1514_v15 = vpop.permute.xlu0 %1513 }
0x1f18   :  { %2469 = vmatmul.mubr.msk.f32.vlgmr.msra.gmra.mxu0 %vm256_vm6, %v1514_v15 }
0x1f19   :  { %2483 = vmatpush3.msra.mxu0 %v2994_v50  ;;  %2490 = vmatprep.mubr.msk.f32.mxu0 %vm2713_vm4, %v2712_v1 }
0x1f1a   :  { %2484 = vmatprep.subr.mxu0 %v2712_v1 }
0x1f1b   :  { %2485 = vmatpush3.msra.mxu0 %v3000_v5 }
0x1f1c   :  { %2486 = vmatprep.subr.mxu0 %v2712_v1 }
0x1f1d   :  { %2487 = vmatpush3.msra.mxu0 %v3009_v8 }
0x1f1e   :  { %2488 = vmatprep.subr.mxu0 %v2712_v1 }
0x1f1f   :  { %2489 = vmatpush3.msra.mxu0 %v3023_v10 }
0x1f20   :  { %2504 = vmatprep.subr.mxu0 %v2712_v1 }
0x1fd8   :  { %v1583_v22 = vpop.f32.mrf.mxu0 }
0x1fd9   :  { %v1588_v17 = vrot.slane %v1583_v22, 2 }
0x1fda   :  { %v2470_v19 = vpop.f32.mrf.mxu0 }
0x1fdb   :  { %v1590_v23 = vadd.f32 %v1588_v17, %v3057_v18 }
0x1fdd   :  { %2622 = vtanh.f32 %v1590_v23  ;;  %v2189_v25 = vmul.f32 -1.442695, %v1590_v23 }
0x1fdf   :  { %2624 = vpow2.f32 %v2189_v25 }
0x1fea   :  { %v2623_v24 = vpop.eup %2622 }
0x1feb   :  { %1603 = vrot.lane.b32.xlu1 %v2623_v24, %s2714_s3 }
0x1fec   :  { %v2625_v26 = vpop.eup %2624 }
0x1fed   :  { %v1594_v27 = vadd.f32 1.0, %v2625_v26 }
0x1fef   :  { %2626 = vrcp.f32 %v1594_v27 }
0x1ffc   :  { %v2627_v28 = vpop.eup %2626 }
0x1ffd   :  { %v1601_v34 = vmul.f32 %v2627_v28, %v1599_v33 }
0x205d   :  { %v1604_v30 = vpop.permute.xlu1 %1603 }
0x205e   :  { %v1606_v32 = vmul.f32 %v2627_v28, %v1604_v30 }
0x2060   :  { %1608 = vrot.lane.b32.xlu0 %v1606_v32, %s2715_s24 }
0x20d2   :  { %v1609_v35 = vpop.permute.xlu0 %1608 }
0x20d3   :  { %v1611_v36 = vadd.f32 %v1609_v35, %v1601_v34 }
0x20d5   :  { %2628 = vtanh.f32 %v1611_v36  ;;  %v1703_v51 = vrot.slane %v1611_v36, 6 }
0x20e2   :  { %v2629_v18 = vpop.eup %2628 }
0x20e3   :  { %1614 = vrot.lane.b32.xlu1 %v2629_v18, %s2714_s3 }
0x2155   :  { %v1615_v37 = vpop.permute.xlu1 %1614 }
0x2156   :  { %v1617_v38 = vmul.f32 %v2627_v28, %v1615_v37 }
0x2158   :  { %v1619_v39 = vrot.slane %v1617_v38, 6 }
0x215a   :  { %1620 = vrot.lane.b32.xlu0 %v1619_v39, %s2715_s24 }
0x21cc   :  { %v1621_v40 = vpop.permute.xlu0 %1620 }
0x21cd   :  { %2480 = vmatmul.mubr.msk.f32.vlgmr.msra.gmra.mxu1 %vm256_vm6, %v1621_v40 }
0x21ce   :  { %2494 = vmatpush3.msra.mxu1 %v2994_v50  ;;  %2501 = vmatprep.mubr.msk.f32.mxu1 %vm2713_vm4, %v2712_v1 }
0x21cf   :  { %2495 = vmatprep.subr.mxu1 %v2712_v1 }
0x21d0   :  { %2496 = vmatpush3.msra.mxu1 %v3000_v5 }
0x21d1   :  { %2497 = vmatprep.subr.mxu1 %v2712_v1 }
0x21d2   :  { %2498 = vmatpush3.msra.mxu1 %v3009_v8 }
0x21d3   :  { %2499 = vmatprep.subr.mxu1 %v2712_v1 }
0x21d4   :  { %2500 = vmatpush3.msra.mxu1 %v3023_v10 }
0x21d5   :  { %2515 = vmatprep.subr.mxu1 %v2712_v1 }
0x228d   :  { %v1690_v41 = vpop.f32.mrf.mxu1 }
0x228e   :  { %v1694_v42 = vadd.f32 %v1690_v41, %v3055_v16 }
0x228f   :  { %v2481_v43 = vpop.f32.mrf.mxu1 }
0x2290   :  { %2630 = vtanh.f32 %v1694_v42  ;;  %v2191_v45 = vmul.f32 -1.442695, %v1694_v42 }
0x2292   :  { %2632 = vpow2.f32 %v2191_v45 }
0x229d   :  { %v2631_v44 = vpop.eup %2630 }
0x229e   :  { %1707 = vrot.lane.b32.xlu1 %v2631_v44, %s2714_s3 }
0x229f   :  { %v2633_v46 = vpop.eup %2632 }
0x22a0   :  { %v1698_v31 = vadd.f32 1.0, %v2633_v46 }
0x22a2   :  { %2634 = vrcp.f32 %v1698_v31 }
0x22af   :  { %v2635_v47 = vpop.eup %2634 }
0x22b0   :  { %v1705_v52 = vmul.f32 %v2635_v47, %v1703_v51 }
0x2310   :  { %v1708_v48 = vpop.permute.xlu1 %1707 }
0x2311   :  { %v1710_v49 = vmul.f32 %v2635_v47, %v1708_v48 }
0x2313   :  { %1712 = vrot.lane.b32.xlu0 %v1710_v49, %s2715_s24 }
0x2385   :  { %v1713_v53 = vpop.permute.xlu0 %1712 }
0x2386   :  { %v1715_v54 = vadd.f32 %v1713_v53, %v1705_v52  ;;  %v2044_v52 = vld [vmem:[%s3190_s8 + $0x10] sm:$0xff]  ;;  %v2043_v53 = vld [vmem:[%s3190_s8 + $0x8] sm:$0xff] }
0x2388   :  { %2636 = vtanh.f32 %v1715_v54 }
0x2395   :  { %v2637_v55 = vpop.eup %2636 }
0x2396   :  { %1718 = vrot.lane.b32.xlu1 %v2637_v55, %s2714_s3 }
0x2408   :  { %v1719_v56 = vpop.permute.xlu1 %1718 }
0x2409   :  { %v1721_v57 = vmul.f32 %v2635_v47, %v1719_v56 }
0x240b   :  { %1723 = vrot.lane.b32.xlu0 %v1721_v57, %s2715_s24 }
0x247d   :  { %v1724_v58 = vpop.permute.xlu0 %1723 }
0x247e   :  { %2491 = vmatmul.mubr.msk.f32.vlgmr.msra.gmra.mxu0 %vm256_vm6, %v1724_v58 }
0x247f   :  { %2505 = vmatpush3.msra.mxu0 %v2994_v50  ;;  %2512 = vmatprep.mubr.msk.f32.mxu0 %vm2713_vm4, %v2712_v1 }
0x2480   :  { %2506 = vmatprep.subr.mxu0 %v2712_v1 }
0x2481   :  { %2507 = vmatpush3.msra.mxu0 %v3000_v5 }
0x2482   :  { %2508 = vmatprep.subr.mxu0 %v2712_v1 }
0x2483   :  { %2509 = vmatpush3.msra.mxu0 %v3009_v8 }
0x2484   :  { %2510 = vmatprep.subr.mxu0 %v2712_v1 }
0x2485   :  { %2511 = vmatpush3.msra.mxu0 %v3023_v10  ;;  %v1809_v10 = vrot.slane %v1715_v54, 6  ;;  %v2042_v54 = vld [vmem:[%s3190_s8] sm:$0xff] }
0x253e   :  { %v1793_v59 = vpop.f32.mrf.mxu0 }
0x253f   :  { %v1798_v60 = vrot.slane %v1793_v59, 6 }
0x2540   :  { %v2492_v61 = vpop.f32.mrf.mxu0 }
0x2541   :  { %v1800_v50 = vadd.f32 %v1798_v60, %v3055_v16  ;;  %v2198_v60 = vld [vmem:[%s3191_s9] ss:$0 sm:$0xff] }
0x2543   :  { %2638 = vtanh.f32 %v1800_v50  ;;  %v2193_v63 = vmul.f32 -1.442695, %v1800_v50 }
0x2545   :  { %2640 = vpow2.f32 %v2193_v63 }
0x2550   :  { %v2639_v62 = vpop.eup %2638 }
0x2551   :  { %1813 = vrot.lane.b32.xlu1 %v2639_v62, %s2714_s3 }
0x2552   :  { %v2641_v5 = vpop.eup %2640 }
0x2553   :  { %v1804_v29 = vadd.f32 1.0, %v2641_v5 }
0x2555   :  { %2642 = vrcp.f32 %v1804_v29 }
0x2562   :  { %v2643_v0 = vpop.eup %2642 }
0x2563   :  { %v1811_v3 = vmul.f32 %v2643_v0, %v1809_v10 }
0x25c3   :  { %v1814_v8 = vpop.permute.xlu1 %1813 }
0x25c4   :  { %v1816_v2 = vmul.f32 %v2643_v0, %v1814_v8 }
0x25c6   :  { %1818 = vrot.lane.b32.xlu0 %v1816_v2, %s2715_s24 }
0x2638   :  { %v1819_v4 = vpop.permute.xlu0 %1818 }
0x2639   :  { %v1821_v6 = vadd.f32 %v1819_v4, %v1811_v3 }
0x263b   :  { %2644 = vtanh.f32 %v1821_v6  ;;  %v1916_v27 = vrot.slane %v1821_v6, 6 }
0x2648   :  { %v2645_v9 = vpop.eup %2644 }
0x2649   :  { %1824 = vrot.lane.b32.xlu1 %v2645_v9, %s2714_s3 }
0x26bb   :  { %v1825_v7 = vpop.permute.xlu1 %1824 }
0x26bc   :  { %v1827_v11 = vmul.f32 %v2643_v0, %v1825_v7 }
0x26be   :  { %v1829_v20 = vrot.slane %v1827_v11, 2 }
0x26c0   :  { %1830 = vrot.lane.b32.xlu0 %v1829_v20, %s2715_s24 }
0x2732   :  { %v1831_v12 = vpop.permute.xlu0 %1830 }
0x2733   :  { %2502 = vmatmul.mubr.msk.f32.vlgmr.msra.gmra.mxu1 %vm256_vm6, %v1831_v12 }
0x2734   :  { %2523 = vmatprep.mubr.msk.f32.mxu1 %vm2713_vm4, %v2712_v1 }
0x27f3   :  { %v1900_v13 = vpop.f32.mrf.mxu1 }
0x27f4   :  { %v1905_v21 = vrot.slane %v1900_v13, 4 }
0x27f5   :  { %v2503_v14 = vpop.f32.mrf.mxu1 }
0x27f6   :  { %v1907_v15 = vadd.f32 %v1905_v21, %v3055_v16 }
0x27f8   :  { %2646 = vtanh.f32 %v1907_v15  ;;  %v2195_v17 = vmul.f32 -1.442695, %v1907_v15 }
0x27fa   :  { %2648 = vpow2.f32 %v2195_v17 }
0x2805   :  { %v2647_v22 = vpop.eup %2646 }
0x2806   :  { %1920 = vrot.lane.b32.xlu1 %v2647_v22, %s2714_s3 }
0x2807   :  { %v2649_v19 = vpop.eup %2648 }
0x2808   :  { %v1911_v23 = vadd.f32 1.0, %v2649_v19 }
0x280a   :  { %2650 = vrcp.f32 %v1911_v23 }
0x2817   :  { %v2651_v24 = vpop.eup %2650 }
0x2818   :  { %v1918_v28 = vmul.f32 %v2651_v24, %v1916_v27 }
0x2878   :  { %v1921_v25 = vpop.permute.xlu1 %1920 }
0x2879   :  { %v1923_v26 = vmul.f32 %v2651_v24, %v1921_v25 }
0x287b   :  { %1925 = vrot.lane.b32.xlu0 %v1923_v26, %s2715_s24 }
0x28ed   :  { %v1926_v30 = vpop.permute.xlu0 %1925 }
0x28ee   :  { %v1928_v32 = vadd.f32 %v1926_v30, %v1918_v28 }
0x28f0   :  { %2652 = vtanh.f32 %v1928_v32  ;;  %v2023_v47 = vrot.slane %v1928_v32, 6 }
0x28fd   :  { %v2653_v33 = vpop.eup %2652 }
0x28fe   :  { %1931 = vrot.lane.b32.xlu1 %v2653_v33, %s2714_s3 }
0x2970   :  { %v1932_v34 = vpop.permute.xlu1 %1931 }
0x2971   :  { %v1934_v35 = vmul.f32 %v2651_v24, %v1932_v34 }
0x2973   :  { %v1936_v36 = vrot.slane %v1934_v35, 4 }
0x2975   :  { %1937 = vrot.lane.b32.xlu0 %v1936_v36, %s2715_s24 }
0x29e7   :  { %v1938_v18 = vpop.permute.xlu0 %1937 }
0x29e8   :  { %2513 = vmatmul.mubr.msk.f32.vlgmr.msra.gmra.mxu0 %vm256_vm6, %v1938_v18 }
0x2aa8   :  { %v2007_v37 = vpop.f32.mrf.mxu0 }
0x2aa9   :  { %v2012_v38 = vrot.slane %v2007_v37, 2 }
0x2aaa   :  { %v2514_v39 = vpop.f32.mrf.mxu0 }
0x2aab   :  { %v2014_v40 = vadd.f32 %v2012_v38, %v3055_v16  ;;  %v2045_v16 = vld [vmem:[%s3190_s8 + $0x18] sm:$0xff]  ;;  %s2716_s8 = smov [#allocation5]  }
0x2aac   :  { %2516 = vmatpush3.msra.mxu1 %v2045_v16 }
0x2aad   :  { %2654 = vtanh.f32 %v2014_v40  ;;  %v2197_v42 = vmul.f32 -1.442695, %v2014_v40  ;;  %2517 = vmatprep.subr.mxu1 %v2712_v1 }
0x2aae   :  { %2518 = vmatpush3.msra.mxu1 %v2044_v52 }
0x2aaf   :  { %2656 = vpow2.f32 %v2197_v42  ;;  %2519 = vmatprep.subr.mxu1 %v2712_v1 }
0x2ab0   :  { %2520 = vmatpush3.msra.mxu1 %v2043_v53 }
0x2ab1   :  { %2521 = vmatprep.subr.mxu1 %v2712_v1 }
0x2ab2   :  { %2522 = vmatpush3.msra.mxu1 %v2042_v54 }
0x2aba   :  { %v2655_v41 = vpop.eup %2654 }
0x2abb   :  { %2027 = vrot.lane.b32.xlu1 %v2655_v41, %s2714_s3 }
0x2abc   :  { %v2657_v43 = vpop.eup %2656 }
0x2abd   :  { %v2018_v44 = vadd.f32 1.0, %v2657_v43 }
0x2abf   :  { %2658 = vrcp.f32 %v2018_v44 }
0x2acc   :  { %v2659_v45 = vpop.eup %2658 }
0x2acd   :  { %v2025_v48 = vmul.f32 %v2659_v45, %v2023_v47 }
0x2b2d   :  { %v2028_v46 = vpop.permute.xlu1 %2027 }
0x2b2e   :  { %v2030_v31 = vmul.f32 %v2659_v45, %v2028_v46 }
0x2b30   :  { %2032 = vrot.lane.b32.xlu0 %v2030_v31, %s2715_s24 }
0x2ba2   :  { %v2033_v49 = vpop.permute.xlu0 %2032 }
0x2ba3   :  { %v2035_v51 = vadd.f32 %v2033_v49, %v2025_v48 }
0x2ba5   :  { %2660 = vtanh.f32 %v2035_v51 }
0x2bb2   :  { %v2661_v55 = vpop.eup %2660 }
0x2bb3   :  { %2038 = vrot.lane.b32.xlu1 %v2661_v55, %s2714_s3  ;;  %s2148_s3 = sshll.u32 %s2716_s8, 4  ;;  %s2149_s3 = int_to_ptr.vmem [resolvable:$true] %s2148_s3 }
0x2bb4   :  { %s2686_s9 = scalar_lea.vmem %s2149_s3, 32  ;;  %p2691_p6 = scmp.lt.s32.totalorder %s2149_s3, %s2149_s3 }
0x2bb5   :  { %p2687_p5 = scmp.ne.s32.totalorder %s2149_s3, %s2686_s9  ;;  %p2692_p7 = scmp.lt.s32.totalorder %s2686_s9, %s2686_s9 }
0x2bb7   :  { %p2693_p8 = por %p2692_p7, %p2691_p6 }
0x2bb9   :  { %p2694_p9 = pnand %p2693_p8, %p2687_p5 }
0x2c25   :  { %v2039_v56 = vpop.permute.xlu1 %2038 }
0x2c26   :  { %v2041_v57 = vmul.f32 %v2659_v45, %v2039_v56 }
0x2c28   :  { %v2054_v58 = vrot.slane %v2041_v57, 6 }
0x2c2a   :  { %2055 = vrot.lane.b32.xlu0 %v2054_v58, %s2715_s24 }
0x2c9c   :  { %v2056_v59 = vpop.permute.xlu0 %2055 }
0x2c9d   :  { %2524 = vmatmul.mubr.msk.f32.vlgmr.msra.gmra.mxu1 %vm256_vm6, %v2056_v59 }
0x2d5d   :  { %v2125_v61 = vpop.f32.mrf.mxu1 }
0x2d5e   :  { %v2126_v50 = vadd.f32 %v2198_v60, %v2125_v61 }
0x2d5f   :  { %v2525_v1 = vpop.f32.mrf.mxu1 }
0x2d60   :  { %v2130_v62 = vsel %vm2129_vm9, %v2126_v50, -inf }
0x2d61   :  { %2131 = vmax.xlane.f32.xlu1 %v2130_v62 }
0x2dea   :  { %v2132_v63 = vpop.xlane.xlu1 %2131 }
0x2deb   :  { %v2133_v5 = vsub.f32 %v2126_v50, %v2132_v63 }
0x2ded   :  { %v2134_v29 = vmul.f32 1.442695, %v2133_v5 }
0x2def   :  { %2662 = vpow2.f32 %v2134_v29 }
0x2dfc   :  { %v2663_v0 = vpop.eup %2662 }
0x2dfd   :  { %v2136_v8 = vsel %vm2129_vm9, %v2663_v0, 0.0 }
0x2dfe   :  { %2137 = vadd.xlane.f32.xlu0 %v2136_v8 }
0x2e87   :  { %v2138_v2 = vpop.xlane.xlu0 %2137 }
0x2e88   :  { %2664 = vrcp.f32 %v2138_v2 }
0x2e95   :  { %v2665_v10 = vpop.eup %2664 }
0x2e96   :  { %v2140_v3 = vmul.f32 %v2665_v10, %v2663_v0 }
0x2e98   :  { %2141 = vst.msk [vmem:[#allocation5] sm:$0x3] %vm2129_vm9, %v2140_v3 }
0x2e99   :  { %2697 = shalt.err (!%p2694_p9)
}
0x2e9a   :  { %2151 = dma.vmem_to_hbm [thread:$0]  %s2149_s3, 32, %s3192_s10, [#allocation4]  }
0x2e9b   :  { %2708 = dma.done.wait [#allocation4], 32  }
0x2e9c   :  { %2709 = vsyncadd [#allocation4], 4294967264 }
0x2e9d   :  { %2155 = vsyncpa [#allocation3], 1 }
0x2e9e   :  { %2156 = vsyncpa [#allocation4], 1 }

</bundles_post_ra>
